<compile_context>
chip_gen: v7x
topology: tpu7x:2x2x1
jax: 0.10.0
libtpu: 0.0.40
codegen_flags: <defaults>
</compile_context>

<pallas_src>
import functools

import numpy as np
import jax
import jax.numpy as jnp
from jax.experimental import pallas as pl
from jax.experimental.pallas import tpu as pltpu

_LANE = 128
_SUBLANE = 8

_KK2, _KK3 = 16, 9          # conv2 4x4, conv3 3x3 kernel offsets
_C1, _C2, _C3, _F1 = 32, 64, 64, 512


def _round_up(v, m):
    return (v + m - 1) // m * m


def _conv_out(size, k, stride):
    return (size - k) // stride + 1


def _nbytes(a):
    return int(a.size) * int(jnp.dtype(a.dtype).itemsize)


# ---------------------------------------------------------------------------
# Fused forward kernel: conv1 -> conv2 -> conv3 -> fc1 -> fc2 -> softmax.
# All operands are whole-array VMEM blocks; intermediates never leave VMEM.
# ---------------------------------------------------------------------------
def _policy_kernel_factory(r2_pad, r3_pad, a_pad):
    f32, bf16 = jnp.float32, jnp.bfloat16

    def kernel(cols1_ref, w1_ref, sel_ref, w23_ref, fc1w_ref, fc2w_ref,
               bias_ref, o_ref, patch2_ref, patch3_ref):
        b1 = bias_ref[0:1, 0:_C1]
        b2 = bias_ref[1:2, 0:_C2]
        b3 = bias_ref[2:3, 0:_C3]
        fc1b = bias_ref[3:4, 0:_F1]
        fc2b = bias_ref[4:5, 0:a_pad]          # -1e30 on padded action columns

        # conv1 (input pre-im2col'ed in the wrapper): one matmul.
        a1 = jnp.dot(cols1_ref[...], w1_ref[...], preferred_element_type=f32)
        a1 = jnp.maximum(a1 + b1, 0.0)                           # (r1_pad, 32) f32

        # conv2: one stacked selection matmul gathers all 16 kernel-offset row
        # sets at once; 16 static block copies lay them out as an im2col patch
        # matrix; one K=512 matmul applies the flattened conv2 weight.
        s2 = sel_ref[0:_KK2 * r2_pad, :]
        g2 = jnp.dot(s2, a1.astype(bf16), preferred_element_type=f32)   # (16*r2_pad, 32)
        for p in range(_KK2):
            patch2_ref[:, p * _C1:(p + 1) * _C1] = g2[p * r2_pad:(p + 1) * r2_pad, :]
        w2f = w23_ref[0:_KK2 * _C1, :]                                   # (512, 64) bf16
        a2 = jnp.dot(patch2_ref[...].astype(bf16), w2f, preferred_element_type=f32)
        a2 = jnp.maximum(a2 + b2, 0.0)                           # (r2_pad, 64) f32

        # conv3 (1x1 spatial output): same stacked-selection + flat-weight
        # scheme, one K=576 matmul.
        s3 = sel_ref[_KK2 * r2_pad:_KK2 * r2_pad + _KK3 * r3_pad, 0:r2_pad]
        g3 = jnp.dot(s3, a2.astype(bf16), preferred_element_type=f32)   # (9*r3_pad, 64)
        for q in range(_KK3):
            patch3_ref[:, q * _C2:(q + 1) * _C2] = g3[q * r3_pad:(q + 1) * r3_pad, :]
        w3f = w23_ref[_KK2 * _C1:_KK2 * _C1 + _KK3 * _C2, :]             # (576, 64) bf16
        a3 = jnp.dot(patch3_ref[...].astype(bf16), w3f, preferred_element_type=f32)
        a3 = jnp.maximum(a3 + b3, 0.0)                           # (r3_pad, 64) == torch flatten

        # fc1 + ReLU, fc2 + softmax over the lane-padded action axis (padded
        # logits carry -1e30 -> exp() zeros them).
        h = jnp.dot(a3.astype(bf16), fc1w_ref[...], preferred_element_type=f32)
        h = jnp.maximum(h + fc1b, 0.0)                           # (r3_pad, 512)
        logits = jnp.dot(h.astype(bf16), fc2w_ref[...], preferred_element_type=f32) + fc2b
        m = jnp.max(logits, axis=-1, keepdims=True)
        e = jnp.exp(logits - m)
        denom = jnp.sum(e, axis=-1, keepdims=True)
        o_ref[...] = (e / denom).astype(o_ref.dtype)             # exact normalization

    return kernel


# ---------------------------------------------------------------------------
# Trace-time helpers (wrapper-side, shapes only)
# ---------------------------------------------------------------------------
def _im2col_conv1(x_nchw, kh, kw, stride):
    """(N, C, H, W) -> (N*oh*ow, kh*kw*C), columns ordered (kh, kw, C)."""
    n, c, h, w = x_nchw.shape
    oh = _conv_out(h, kh, stride)
    ow = _conv_out(w, kw, stride)
    xh = jnp.transpose(x_nchw, (0, 2, 3, 1))                      # NHWC
    patches = [xh[:, i:i + stride * oh:stride, j:j + stride * ow:stride, :]
               for i in range(kh) for j in range(kw)]
    p = jnp.stack(patches, axis=3)                                # (n, oh, ow, kh*kw, c)
    return p.reshape(n * oh * ow, kh * kw * c)


def build_selection(n, in_h, in_w):
    """Stacked 0/1 gather matrices for conv2 and conv3, packed in one bf16
    operand.  Rows [0, 16*r2_pad): conv2 offset p picks a1 rows; rows
    [16*r2_pad, +9*r3_pad): conv3 offset q picks a2 rows (lanes [0, r2_pad)).
    Built once per (batch, spatial) at prepare time (hoisted out of jit)."""
    oh1, ow1 = _conv_out(in_h, 8, 4), _conv_out(in_w, 8, 4)
    oh2, ow2 = _conv_out(oh1, 4, 2), _conv_out(ow1, 4, 2)
    oh3, ow3 = _conv_out(oh2, 3, 1), _conv_out(ow2, 3, 1)
    assert oh3 == 1 and ow3 == 1, "fc1(in_features=64) requires 1x1 conv3 output"
    r1_pad = _round_up(n * oh1 * ow1, _SUBLANE)
    r2_pad = _round_up(n * oh2 * ow2, _SUBLANE)
    r3_pad = _round_up(n, _SUBLANE)

    sel = np.zeros((_KK2 * r2_pad + _KK3 * r3_pad, r1_pad), np.float32)
    for i in range(4):                       # conv2: 4x4 kernel, stride 2
        for j in range(4):
            p = i * 4 + j
            for b in range(n):
                for oy in range(oh2):
                    for ox in range(ow2):
                        r_out = (b * oh2 + oy) * ow2 + ox
                        r_in = (b * oh1 + oy * 2 + i) * ow1 + ox * 2 + j
                        sel[p * r2_pad + r_out, r_in] = 1.0
    base = _KK2 * r2_pad
    for i in range(3):                       # conv3: 3x3 kernel, stride 1, 1x1 out
        for j in range(3):
            q = i * 3 + j
            for b in range(n):
                r_in = (b * oh2 + i) * ow2 + j
                sel[base + q * r3_pad + b, r_in] = 1.0
    return jnp.asarray(sel, jnp.bfloat16)    # 0/1 values are exact in bf16


def prepare_params(raw, num_actions):
    """One-time weight re-layout (hoisted off the inference path):
    conv (OC, IC, KH, KW) -> flat ((KH*KW*IC), OC); fc (out, in) -> (in, out);
    fc2 lane-padded; conv2+conv3 weights concatenated; all 5 biases packed in
    one f32 buffer (fc2 pad columns hold the -1e30 logit bias)."""
    bf16 = jnp.bfloat16

    def conv_w(w):
        oc, ic, kh, kw = w.shape
        return jnp.transpose(w, (2, 3, 1, 0)).reshape(kh * kw * ic, oc)

    a_pad = _round_up(num_actions, _LANE)
    w23 = jnp.concatenate([conv_w(raw["w2"]), conv_w(raw["w3"])], axis=0)   # (1088, 64)

    fc2_w = jnp.zeros((raw["fc2_w"].shape[1], a_pad), jnp.float32)
    fc2_w = fc2_w.at[:, :num_actions].set(raw["fc2_w"].T)

    bw = max(_F1, a_pad)
    bias = jnp.zeros((8, bw), jnp.float32)
    bias = bias.at[0, :_C1].set(raw["b1"])
    bias = bias.at[1, :_C2].set(raw["b2"])
    bias = bias.at[2, :_C3].set(raw["b3"])
    bias = bias.at[3, :_F1].set(raw["fc1_b"])
    fc2_b_row = jnp.full((a_pad,), -1e30, jnp.float32).at[:num_actions].set(raw["fc2_b"])
    bias = bias.at[4, :a_pad].set(fc2_b_row)

    return {
        "w1": conv_w(raw["w1"]).astype(bf16),      # (8*8*C, 32)
        "w23": w23.astype(bf16),                   # (512+576, 64)
        "fc1_w": raw["fc1_w"].T.astype(bf16),      # (64, 512)
        "fc2_w": fc2_w.astype(bf16),               # (512, a_pad)
        "bias": bias,                              # (8, max(512, a_pad)) f32
    }


# ---------------------------------------------------------------------------
# PolicyNet forward (single fused pallas_call)
# ---------------------------------------------------------------------------
@functools.partial(jax.jit, static_argnames=("num_actions",))
def policy_net_forward(x, params, sel, *, num_actions):
    n, _, h, w = x.shape
    oh1, ow1 = _conv_out(h, 8, 4), _conv_out(w, 8, 4)
    oh2, ow2 = _conv_out(oh1, 4, 2), _conv_out(ow1, 4, 2)
    oh3, ow3 = _conv_out(oh2, 3, 1), _conv_out(ow2, 3, 1)
    assert oh3 == 1 and ow3 == 1, "fc1(in_features=64) requires 1x1 conv3 output"

    r1 = n * oh1 * ow1
    r1_pad = _round_up(r1, _SUBLANE)
    r2_pad = _round_up(n * oh2 * ow2, _SUBLANE)
    r3_pad = _round_up(n, _SUBLANE)
    a_pad = params["fc2_w"].shape[1]

    # TODO(synk): conv1 patch extraction on the external NCHW input stays as
    # thin wrapper-side XLA glue (fused with the bf16 cast); everything
    # downstream runs in the single kernel below.
    cols1 = _im2col_conv1(x, 8, 8, 4)                              # (n*oh1*ow1, 8*8*C)
    if r1_pad != r1:
        cols1 = jnp.pad(cols1, ((0, r1_pad - r1), (0, 0)))
    cols1 = cols1.astype(jnp.bfloat16)
    kkc1 = cols1.shape[1]

    flops = 2 * (r1_pad * kkc1 * _C1                      # conv1
                 + _KK2 * r2_pad * r1_pad * _C1           # conv2 gather
                 + r2_pad * (_KK2 * _C1) * _C2            # conv2 weight
                 + _KK3 * r3_pad * r2_pad * _C2           # conv3 gather
                 + r3_pad * (_KK3 * _C2) * _C3            # conv3 weight
                 + r3_pad * _C3 * _F1                     # fc1
                 + r3_pad * _F1 * a_pad)                  # fc2
    bytes_accessed = (sum(_nbytes(a) for a in
                          (cols1, sel, params["w1"], params["w23"],
                           params["fc1_w"], params["fc2_w"], params["bias"]))
                      + r3_pad * a_pad * 4)

    kernel = _policy_kernel_factory(r2_pad, r3_pad, a_pad)
    out = pl.pallas_call(
        kernel,
        out_shape=jax.ShapeDtypeStruct((r3_pad, a_pad), jnp.float32),
        in_specs=[pl.BlockSpec(memory_space=pltpu.MemorySpace.VMEM)] * 7,
        out_specs=pl.BlockSpec(memory_space=pltpu.MemorySpace.VMEM),
        scratch_shapes=[pltpu.VMEM((r2_pad, _KK2 * _C1), jnp.float32),   # conv2 patches
                        pltpu.VMEM((r3_pad, _KK3 * _C2), jnp.float32)],  # conv3 patches
        compiler_params=pltpu.CompilerParams(vmem_limit_bytes=32 * 1024 * 1024),
        cost_estimate=pl.CostEstimate(flops=int(flops),
                                      transcendentals=int(r3_pad * a_pad),
                                      bytes_accessed=int(bytes_accessed)),
    )(cols1, params["w1"], sel, params["w23"],
      params["fc1_w"], params["fc2_w"], params["bias"])
    return out[:n, :num_actions]


# ---------------------------------------------------------------------------
# Params (PyTorch layouts) + pure-JAX reference of the original module
# ---------------------------------------------------------------------------
def init_params(key, in_channels, num_actions):
    ks = jax.random.split(key, 10)
    s = 0.05
    return {
        "w1": s * jax.random.normal(ks[0], (32, in_channels, 8, 8), jnp.float32),
        "b1": s * jax.random.normal(ks[1], (32,), jnp.float32),
        "w2": s * jax.random.normal(ks[2], (64, 32, 4, 4), jnp.float32),
        "b2": s * jax.random.normal(ks[3], (64,), jnp.float32),
        "w3": s * jax.random.normal(ks[4], (64, 64, 3, 3), jnp.float32),
        "b3": s * jax.random.normal(ks[5], (64,), jnp.float32),
        "fc1_w": s * jax.random.normal(ks[6], (512, 64), jnp.float32),   # (out, in)
        "fc1_b": s * jax.random.normal(ks[7], (512,), jnp.float32),
        "fc2_w": s * jax.random.normal(ks[8], (num_actions, 512), jnp.float32),
        "fc2_b": s * jax.random.normal(ks[9], (num_actions,), jnp.float32),
    }


def _reference_forward(x, raw):
    def conv(x, w, b, stride):
        y = jax.lax.conv_general_dilated(
            x, w, window_strides=(stride, stride), padding="VALID",
            dimension_numbers=("NCHW", "OIHW", "NCHW"))
        return jax.nn.relu(y + b[None, :, None, None])
    x = conv(x, raw["w1"], raw["b1"], 4)
    x = conv(x, raw["w2"], raw["b2"], 2)
    x = conv(x, raw["w3"], raw["b3"], 1)
    x = x.reshape(x.shape[0], -1)
    x = jax.nn.relu(x @ raw["fc1_w"].T + raw["fc1_b"])
    x = x @ raw["fc2_w"].T + raw["fc2_b"]
    return jax.nn.softmax(x, axis=1)


if __name__ == "__main__":
    # 36x36 input: 36 -conv1(8,s4)-> 8 -conv2(4,s2)-> 3 -conv3(3,s1)-> 1,
    # matching fc1's in_features=64.
    batch, in_channels, num_actions = 2, 4, 6
    key = jax.random.PRNGKey(0)
    k_x, k_p = jax.random.split(key)
    x = jax.random.normal(k_x, (batch, in_channels, 36, 36), jnp.float32)
    raw = init_params(k_p, in_channels, num_actions)
    params = prepare_params(raw, num_actions)
    sel = build_selection(batch, 36, 36)

    out = policy_net_forward(x, params, sel, num_actions=num_actions)
    out = jax.block_until_ready(out)

    assert out.shape == (batch, num_actions)
    # exact softmax normalization -> rows sum to 1 at f32 precision
    assert bool(jnp.all(jnp.abs(jnp.sum(out, axis=1) - 1.0) < 1e-5))
    # cross-check against a pure-JAX f32 reference of the PyTorch module
    # (operands are bf16 on the MXU, accumulation f32 -> loose-ish tolerance)
    ref = _reference_forward(x, raw)
    assert bool(jnp.max(jnp.abs(out - ref)) < 1e-2)
    print("KERNEL_OK")
</pallas_src>

<mosaic_0001>
module attributes {stable_mosaic.version = 11 : i64} {
  func.func @kernel(%arg0: memref<128x256xbf16, #tpu.memory_space<vmem>>, %arg1: memref<256x32xbf16, #tpu.memory_space<vmem>>, %arg2: memref<456x128xbf16, #tpu.memory_space<vmem>>, %arg3: memref<1088x64xbf16, #tpu.memory_space<vmem>>, %arg4: memref<64x512xbf16, #tpu.memory_space<vmem>>, %arg5: memref<512x128xbf16, #tpu.memory_space<vmem>>, %arg6: memref<8x512xf32, #tpu.memory_space<vmem>>, %arg7: memref<8x128xf32, #tpu.memory_space<vmem>>, %arg8: memref<24x512xf32, #tpu.memory_space<vmem>>, %arg9: memref<8x576xf32, #tpu.memory_space<vmem>>) attributes {dimension_semantics = [], scalar_prefetch = 0 : i64, scratch_operands = 2 : i64, tpu.core_type = #tpu.core_type<tc>} {
    %c0 = arith.constant 0 : index
    %c0_0 = arith.constant 0 : index
    %0 = vector.load %arg6[%c0, %c0_0] : memref<8x512xf32, #tpu.memory_space<vmem>>, vector<1x32xf32>
    %c1 = arith.constant 1 : index
    %c0_1 = arith.constant 0 : index
    %1 = vector.load %arg6[%c1, %c0_1] : memref<8x512xf32, #tpu.memory_space<vmem>>, vector<1x64xf32>
    %c2 = arith.constant 2 : index
    %c0_2 = arith.constant 0 : index
    %2 = vector.load %arg6[%c2, %c0_2] : memref<8x512xf32, #tpu.memory_space<vmem>>, vector<1x64xf32>
    %c3 = arith.constant 3 : index
    %c0_3 = arith.constant 0 : index
    %3 = vector.load %arg6[%c3, %c0_3] : memref<8x512xf32, #tpu.memory_space<vmem>>, vector<1x512xf32>
    %c4 = arith.constant 4 : index
    %c0_4 = arith.constant 0 : index
    %4 = vector.load %arg6[%c4, %c0_4] : memref<8x512xf32, #tpu.memory_space<vmem>>, vector<1x128xf32>
    %c0_5 = arith.constant 0 : index
    %c0_6 = arith.constant 0 : index
    %5 = vector.load %arg0[%c0_5, %c0_6] : memref<128x256xbf16, #tpu.memory_space<vmem>>, vector<128x256xbf16>
    %c0_7 = arith.constant 0 : index
    %c0_8 = arith.constant 0 : index
    %6 = vector.load %arg1[%c0_7, %c0_8] : memref<256x32xbf16, #tpu.memory_space<vmem>>, vector<256x32xbf16>
    %cst = arith.constant dense<0.000000e+00> : vector<128x32xf32>
    %7 = tpu.matmul %5, %6, %cst {dimension_numbers = #tpu.dot_dimension_numbers<[1], [0], [0], [1], [0, 0, 1, 1], [], []>} : vector<128x256xbf16>, vector<256x32xbf16>, vector<128x32xf32> -> vector<128x32xf32>
    %8 = vector.broadcast %0 : vector<1x32xf32> to vector<128x32xf32>
    %9 = arith.addf %7, %8 : vector<128x32xf32>
    %cst_9 = arith.constant 0.000000e+00 : f32
    %10 = vector.broadcast %cst_9 : f32 to vector<128x32xf32>
    %11 = arith.maximumf %9, %10 : vector<128x32xf32>
    %c0_10 = arith.constant 0 : index
    %c0_11 = arith.constant 0 : index
    %12 = vector.load %arg2[%c0_10, %c0_11] : memref<456x128xbf16, #tpu.memory_space<vmem>>, vector<384x128xbf16>
    %13 = arith.truncf %11 : vector<128x32xf32> to vector<128x32xbf16>
    %cst_12 = arith.constant dense<0.000000e+00> : vector<384x32xf32>
    %14 = tpu.matmul %12, %13, %cst_12 {dimension_numbers = #tpu.dot_dimension_numbers<[1], [0], [0], [1], [0, 0, 1, 1], [], []>} : vector<384x128xbf16>, vector<128x32xbf16>, vector<384x32xf32> -> vector<384x32xf32>
    %15 = vector.extract_strided_slice %14 {offsets = [0, 0], sizes = [24, 32], strides = [1, 1]} : vector<384x32xf32> to vector<24x32xf32>
    %c0_13 = arith.constant 0 : index
    %c0_14 = arith.constant 0 : index
    %16 = vector.load %arg8[%c0_13, %c0_14] : memref<24x512xf32, #tpu.memory_space<vmem>>, vector<24x32xf32>
    tpu.vector_store %arg8[%c0_13, %c0_14], %15 {strides = array<i32>} : memref<24x512xf32, #tpu.memory_space<vmem>>, vector<24x32xf32>,
    %17 = vector.extract_strided_slice %14 {offsets = [24, 0], sizes = [24, 32], strides = [1, 1]} : vector<384x32xf32> to vector<24x32xf32>
    %c0_15 = arith.constant 0 : index
    %c32 = arith.constant 32 : index
    %18 = vector.load %arg8[%c0_15, %c32] : memref<24x512xf32, #tpu.memory_space<vmem>>, vector<24x32xf32>
    tpu.vector_store %arg8[%c0_15, %c32], %17 {strides = array<i32>} : memref<24x512xf32, #tpu.memory_space<vmem>>, vector<24x32xf32>,
    %19 = vector.extract_strided_slice %14 {offsets = [48, 0], sizes = [24, 32], strides = [1, 1]} : vector<384x32xf32> to vector<24x32xf32>
    %c0_16 = arith.constant 0 : index
    %c64 = arith.constant 64 : index
    %20 = vector.load %arg8[%c0_16, %c64] : memref<24x512xf32, #tpu.memory_space<vmem>>, vector<24x32xf32>
    tpu.vector_store %arg8[%c0_16, %c64], %19 {strides = array<i32>} : memref<24x512xf32, #tpu.memory_space<vmem>>, vector<24x32xf32>,
    %21 = vector.extract_strided_slice %14 {offsets = [72, 0], sizes = [24, 32], strides = [1, 1]} : vector<384x32xf32> to vector<24x32xf32>
    %c0_17 = arith.constant 0 : index
    %c96 = arith.constant 96 : index
    %22 = vector.load %arg8[%c0_17, %c96] : memref<24x512xf32, #tpu.memory_space<vmem>>, vector<24x32xf32>
    tpu.vector_store %arg8[%c0_17, %c96], %21 {strides = array<i32>} : memref<24x512xf32, #tpu.memory_space<vmem>>, vector<24x32xf32>,
    %23 = vector.extract_strided_slice %14 {offsets = [96, 0], sizes = [24, 32], strides = [1, 1]} : vector<384x32xf32> to vector<24x32xf32>
    %c0_18 = arith.constant 0 : index
    %c128 = arith.constant 128 : index
    %24 = vector.load %arg8[%c0_18, %c128] : memref<24x512xf32, #tpu.memory_space<vmem>>, vector<24x32xf32>
    tpu.vector_store %arg8[%c0_18, %c128], %23 {strides = array<i32>} : memref<24x512xf32, #tpu.memory_space<vmem>>, vector<24x32xf32>,
    %25 = vector.extract_strided_slice %14 {offsets = [120, 0], sizes = [24, 32], strides = [1, 1]} : vector<384x32xf32> to vector<24x32xf32>
    %c0_19 = arith.constant 0 : index
    %c160 = arith.constant 160 : index
    %26 = vector.load %arg8[%c0_19, %c160] : memref<24x512xf32, #tpu.memory_space<vmem>>, vector<24x32xf32>
    tpu.vector_store %arg8[%c0_19, %c160], %25 {strides = array<i32>} : memref<24x512xf32, #tpu.memory_space<vmem>>, vector<24x32xf32>,
    %27 = vector.extract_strided_slice %14 {offsets = [144, 0], sizes = [24, 32], strides = [1, 1]} : vector<384x32xf32> to vector<24x32xf32>
    %c0_20 = arith.constant 0 : index
    %c192 = arith.constant 192 : index
    %28 = vector.load %arg8[%c0_20, %c192] : memref<24x512xf32, #tpu.memory_space<vmem>>, vector<24x32xf32>
    tpu.vector_store %arg8[%c0_20, %c192], %27 {strides = array<i32>} : memref<24x512xf32, #tpu.memory_space<vmem>>, vector<24x32xf32>,
    %29 = vector.extract_strided_slice %14 {offsets = [168, 0], sizes = [24, 32], strides = [1, 1]} : vector<384x32xf32> to vector<24x32xf32>
    %c0_21 = arith.constant 0 : index
    %c224 = arith.constant 224 : index
    %30 = vector.load %arg8[%c0_21, %c224] : memref<24x512xf32, #tpu.memory_space<vmem>>, vector<24x32xf32>
    tpu.vector_store %arg8[%c0_21, %c224], %29 {strides = array<i32>} : memref<24x512xf32, #tpu.memory_space<vmem>>, vector<24x32xf32>,
    %31 = vector.extract_strided_slice %14 {offsets = [192, 0], sizes = [24, 32], strides = [1, 1]} : vector<384x32xf32> to vector<24x32xf32>
    %c0_22 = arith.constant 0 : index
    %c256 = arith.constant 256 : index
    %32 = vector.load %arg8[%c0_22, %c256] : memref<24x512xf32, #tpu.memory_space<vmem>>, vector<24x32xf32>
    tpu.vector_store %arg8[%c0_22, %c256], %31 {strides = array<i32>} : memref<24x512xf32, #tpu.memory_space<vmem>>, vector<24x32xf32>,
    %33 = vector.extract_strided_slice %14 {offsets = [216, 0], sizes = [24, 32], strides = [1, 1]} : vector<384x32xf32> to vector<24x32xf32>
    %c0_23 = arith.constant 0 : index
    %c288 = arith.constant 288 : index
    %34 = vector.load %arg8[%c0_23, %c288] : memref<24x512xf32, #tpu.memory_space<vmem>>, vector<24x32xf32>
    tpu.vector_store %arg8[%c0_23, %c288], %33 {strides = array<i32>} : memref<24x512xf32, #tpu.memory_space<vmem>>, vector<24x32xf32>,
    %35 = vector.extract_strided_slice %14 {offsets = [240, 0], sizes = [24, 32], strides = [1, 1]} : vector<384x32xf32> to vector<24x32xf32>
    %c0_24 = arith.constant 0 : index
    %c320 = arith.constant 320 : index
    %36 = vector.load %arg8[%c0_24, %c320] : memref<24x512xf32, #tpu.memory_space<vmem>>, vector<24x32xf32>
    tpu.vector_store %arg8[%c0_24, %c320], %35 {strides = array<i32>} : memref<24x512xf32, #tpu.memory_space<vmem>>, vector<24x32xf32>,
    %37 = vector.extract_strided_slice %14 {offsets = [264, 0], sizes = [24, 32], strides = [1, 1]} : vector<384x32xf32> to vector<24x32xf32>
    %c0_25 = arith.constant 0 : index
    %c352 = arith.constant 352 : index
    %38 = vector.load %arg8[%c0_25, %c352] : memref<24x512xf32, #tpu.memory_space<vmem>>, vector<24x32xf32>
    tpu.vector_store %arg8[%c0_25, %c352], %37 {strides = array<i32>} : memref<24x512xf32, #tpu.memory_space<vmem>>, vector<24x32xf32>,
    %39 = vector.extract_strided_slice %14 {offsets = [288, 0], sizes = [24, 32], strides = [1, 1]} : vector<384x32xf32> to vector<24x32xf32>
    %c0_26 = arith.constant 0 : index
    %c384 = arith.constant 384 : index
    %40 = vector.load %arg8[%c0_26, %c384] : memref<24x512xf32, #tpu.memory_space<vmem>>, vector<24x32xf32>
    tpu.vector_store %arg8[%c0_26, %c384], %39 {strides = array<i32>} : memref<24x512xf32, #tpu.memory_space<vmem>>, vector<24x32xf32>,
    %41 = vector.extract_strided_slice %14 {offsets = [312, 0], sizes = [24, 32], strides = [1, 1]} : vector<384x32xf32> to vector<24x32xf32>
    %c0_27 = arith.constant 0 : index
    %c416 = arith.constant 416 : index
    %42 = vector.load %arg8[%c0_27, %c416] : memref<24x512xf32, #tpu.memory_space<vmem>>, vector<24x32xf32>
    tpu.vector_store %arg8[%c0_27, %c416], %41 {strides = array<i32>} : memref<24x512xf32, #tpu.memory_space<vmem>>, vector<24x32xf32>,
    %43 = vector.extract_strided_slice %14 {offsets = [336, 0], sizes = [24, 32], strides = [1, 1]} : vector<384x32xf32> to vector<24x32xf32>
    %c0_28 = arith.constant 0 : index
    %c448 = arith.constant 448 : index
    %44 = vector.load %arg8[%c0_28, %c448] : memref<24x512xf32, #tpu.memory_space<vmem>>, vector<24x32xf32>
    tpu.vector_store %arg8[%c0_28, %c448], %43 {strides = array<i32>} : memref<24x512xf32, #tpu.memory_space<vmem>>, vector<24x32xf32>,
    %45 = vector.extract_strided_slice %14 {offsets = [360, 0], sizes = [24, 32], strides = [1, 1]} : vector<384x32xf32> to vector<24x32xf32>
    %c0_29 = arith.constant 0 : index
    %c480 = arith.constant 480 : index
    %46 = vector.load %arg8[%c0_29, %c480] : memref<24x512xf32, #tpu.memory_space<vmem>>, vector<24x32xf32>
    tpu.vector_store %arg8[%c0_29, %c480], %45 {strides = array<i32>} : memref<24x512xf32, #tpu.memory_space<vmem>>, vector<24x32xf32>,
    %c0_30 = arith.constant 0 : index
    %c0_31 = arith.constant 0 : index
    %47 = vector.load %arg3[%c0_30, %c0_31] : memref<1088x64xbf16, #tpu.memory_space<vmem>>, vector<512x64xbf16>
    %c0_32 = arith.constant 0 : index
    %c0_33 = arith.constant 0 : index
    %48 = vector.load %arg8[%c0_32, %c0_33] : memref<24x512xf32, #tpu.memory_space<vmem>>, vector<24x512xf32>
    %49 = arith.truncf %48 : vector<24x512xf32> to vector<24x512xbf16>
    %cst_34 = arith.constant dense<0.000000e+00> : vector<24x64xf32>
    %50 = tpu.matmul %49, %47, %cst_34 {dimension_numbers = #tpu.dot_dimension_numbers<[1], [0], [0], [1], [0, 0, 1, 1], [], []>} : vector<24x512xbf16>, vector<512x64xbf16>, vector<24x64xf32> -> vector<24x64xf32>
    %51 = vector.broadcast %1 : vector<1x64xf32> to vector<24x64xf32>
    %52 = arith.addf %50, %51 : vector<24x64xf32>
    %cst_35 = arith.constant 0.000000e+00 : f32
    %53 = vector.broadcast %cst_35 : f32 to vector<24x64xf32>
    %54 = arith.maximumf %52, %53 : vector<24x64xf32>
    %c384_36 = arith.constant 384 : index
    %c0_37 = arith.constant 0 : index
    %55 = vector.load %arg2[%c384_36, %c0_37] : memref<456x128xbf16, #tpu.memory_space<vmem>>, vector<72x24xbf16>
    %56 = arith.truncf %54 : vector<24x64xf32> to vector<24x64xbf16>
    %cst_38 = arith.constant dense<0.000000e+00> : vector<72x64xf32>
    %57 = tpu.matmul %55, %56, %cst_38 {dimension_numbers = #tpu.dot_dimension_numbers<[1], [0], [0], [1], [0, 0, 1, 1], [], []>} : vector<72x24xbf16>, vector<24x64xbf16>, vector<72x64xf32> -> vector<72x64xf32>
    %58 = vector.extract_strided_slice %57 {offsets = [0, 0], sizes = [8, 64], strides = [1, 1]} : vector<72x64xf32> to vector<8x64xf32>
    %c0_39 = arith.constant 0 : index
    %c0_40 = arith.constant 0 : index
    %59 = vector.load %arg9[%c0_39, %c0_40] : memref<8x576xf32, #tpu.memory_space<vmem>>, vector<8x64xf32>
    tpu.vector_store %arg9[%c0_39, %c0_40], %58 {strides = array<i32>} : memref<8x576xf32, #tpu.memory_space<vmem>>, vector<8x64xf32>,
    %60 = vector.extract_strided_slice %57 {offsets = [8, 0], sizes = [8, 64], strides = [1, 1]} : vector<72x64xf32> to vector<8x64xf32>
    %c0_41 = arith.constant 0 : index
    %c64_42 = arith.constant 64 : index
    %61 = vector.load %arg9[%c0_41, %c64_42] : memref<8x576xf32, #tpu.memory_space<vmem>>, vector<8x64xf32>
    tpu.vector_store %arg9[%c0_41, %c64_42], %60 {strides = array<i32>} : memref<8x576xf32, #tpu.memory_space<vmem>>, vector<8x64xf32>,
    %62 = vector.extract_strided_slice %57 {offsets = [16, 0], sizes = [8, 64], strides = [1, 1]} : vector<72x64xf32> to vector<8x64xf32>
    %c0_43 = arith.constant 0 : index
    %c128_44 = arith.constant 128 : index
    %63 = vector.load %arg9[%c0_43, %c128_44] : memref<8x576xf32, #tpu.memory_space<vmem>>, vector<8x64xf32>
    tpu.vector_store %arg9[%c0_43, %c128_44], %62 {strides = array<i32>} : memref<8x576xf32, #tpu.memory_space<vmem>>, vector<8x64xf32>,
    %64 = vector.extract_strided_slice %57 {offsets = [24, 0], sizes = [8, 64], strides = [1, 1]} : vector<72x64xf32> to vector<8x64xf32>
    %c0_45 = arith.constant 0 : index
    %c192_46 = arith.constant 192 : index
    %65 = vector.load %arg9[%c0_45, %c192_46] : memref<8x576xf32, #tpu.memory_space<vmem>>, vector<8x64xf32>
    tpu.vector_store %arg9[%c0_45, %c192_46], %64 {strides = array<i32>} : memref<8x576xf32, #tpu.memory_space<vmem>>, vector<8x64xf32>,
    %66 = vector.extract_strided_slice %57 {offsets = [32, 0], sizes = [8, 64], strides = [1, 1]} : vector<72x64xf32> to vector<8x64xf32>
    %c0_47 = arith.constant 0 : index
    %c256_48 = arith.constant 256 : index
    %67 = vector.load %arg9[%c0_47, %c256_48] : memref<8x576xf32, #tpu.memory_space<vmem>>, vector<8x64xf32>
    tpu.vector_store %arg9[%c0_47, %c256_48], %66 {strides = array<i32>} : memref<8x576xf32, #tpu.memory_space<vmem>>, vector<8x64xf32>,
    %68 = vector.extract_strided_slice %57 {offsets = [40, 0], sizes = [8, 64], strides = [1, 1]} : vector<72x64xf32> to vector<8x64xf32>
    %c0_49 = arith.constant 0 : index
    %c320_50 = arith.constant 320 : index
    %69 = vector.load %arg9[%c0_49, %c320_50] : memref<8x576xf32, #tpu.memory_space<vmem>>, vector<8x64xf32>
    tpu.vector_store %arg9[%c0_49, %c320_50], %68 {strides = array<i32>} : memref<8x576xf32, #tpu.memory_space<vmem>>, vector<8x64xf32>,
    %70 = vector.extract_strided_slice %57 {offsets = [48, 0], sizes = [8, 64], strides = [1, 1]} : vector<72x64xf32> to vector<8x64xf32>
    %c0_51 = arith.constant 0 : index
    %c384_52 = arith.constant 384 : index
    %71 = vector.load %arg9[%c0_51, %c384_52] : memref<8x576xf32, #tpu.memory_space<vmem>>, vector<8x64xf32>
    tpu.vector_store %arg9[%c0_51, %c384_52], %70 {strides = array<i32>} : memref<8x576xf32, #tpu.memory_space<vmem>>, vector<8x64xf32>,
    %72 = vector.extract_strided_slice %57 {offsets = [56, 0], sizes = [8, 64], strides = [1, 1]} : vector<72x64xf32> to vector<8x64xf32>
    %c0_53 = arith.constant 0 : index
    %c448_54 = arith.constant 448 : index
    %73 = vector.load %arg9[%c0_53, %c448_54] : memref<8x576xf32, #tpu.memory_space<vmem>>, vector<8x64xf32>
    tpu.vector_store %arg9[%c0_53, %c448_54], %72 {strides = array<i32>} : memref<8x576xf32, #tpu.memory_space<vmem>>, vector<8x64xf32>,
    %74 = vector.extract_strided_slice %57 {offsets = [64, 0], sizes = [8, 64], strides = [1, 1]} : vector<72x64xf32> to vector<8x64xf32>
    %c0_55 = arith.constant 0 : index
    %c512 = arith.constant 512 : index
    %75 = vector.load %arg9[%c0_55, %c512] : memref<8x576xf32, #tpu.memory_space<vmem>>, vector<8x64xf32>
    tpu.vector_store %arg9[%c0_55, %c512], %74 {strides = array<i32>} : memref<8x576xf32, #tpu.memory_space<vmem>>, vector<8x64xf32>,
    %c512_56 = arith.constant 512 : index
    %c0_57 = arith.constant 0 : index
    %76 = vector.load %arg3[%c512_56, %c0_57] : memref<1088x64xbf16, #tpu.memory_space<vmem>>, vector<576x64xbf16>
    %c0_58 = arith.constant 0 : index
    %c0_59 = arith.constant 0 : index
    %77 = vector.load %arg9[%c0_58, %c0_59] : memref<8x576xf32, #tpu.memory_space<vmem>>, vector<8x576xf32>
    %78 = arith.truncf %77 : vector<8x576xf32> to vector<8x576xbf16>
    %cst_60 = arith.constant dense<0.000000e+00> : vector<8x64xf32>
    %79 = tpu.matmul %78, %76, %cst_60 {dimension_numbers = #tpu.dot_dimension_numbers<[1], [0], [0], [1], [0, 0, 1, 1], [], []>} : vector<8x576xbf16>, vector<576x64xbf16>, vector<8x64xf32> -> vector<8x64xf32>
    %80 = vector.broadcast %2 : vector<1x64xf32> to vector<8x64xf32>
    %81 = arith.addf %79, %80 : vector<8x64xf32>
    %cst_61 = arith.constant 0.000000e+00 : f32
    %82 = vector.broadcast %cst_61 : f32 to vector<8x64xf32>
    %83 = arith.maximumf %81, %82 : vector<8x64xf32>
    %84 = arith.truncf %83 : vector<8x64xf32> to vector<8x64xbf16>
    %c0_62 = arith.constant 0 : index
    %c0_63 = arith.constant 0 : index
    %85 = vector.load %arg4[%c0_62, %c0_63] : memref<64x512xbf16, #tpu.memory_space<vmem>>, vector<64x512xbf16>
    %cst_64 = arith.constant dense<0.000000e+00> : vector<8x512xf32>
    %86 = tpu.matmul %84, %85, %cst_64 {dimension_numbers = #tpu.dot_dimension_numbers<[1], [0], [0], [1], [0, 0, 1, 1], [], []>} : vector<8x64xbf16>, vector<64x512xbf16>, vector<8x512xf32> -> vector<8x512xf32>
    %87 = vector.broadcast %3 : vector<1x512xf32> to vector<8x512xf32>
    %88 = arith.addf %86, %87 : vector<8x512xf32>
    %cst_65 = arith.constant 0.000000e+00 : f32
    %89 = vector.broadcast %cst_65 : f32 to vector<8x512xf32>
    %90 = arith.maximumf %88, %89 : vector<8x512xf32>
    %91 = arith.truncf %90 : vector<8x512xf32> to vector<8x512xbf16>
    %c0_66 = arith.constant 0 : index
    %c0_67 = arith.constant 0 : index
    %92 = vector.load %arg5[%c0_66, %c0_67] : memref<512x128xbf16, #tpu.memory_space<vmem>>, vector<512x128xbf16>
    %cst_68 = arith.constant dense<0.000000e+00> : vector<8x128xf32>
    %93 = tpu.matmul %91, %92, %cst_68 {dimension_numbers = #tpu.dot_dimension_numbers<[1], [0], [0], [1], [0, 0, 1, 1], [], []>} : vector<8x512xbf16>, vector<512x128xbf16>, vector<8x128xf32> -> vector<8x128xf32>
    %94 = vector.broadcast %4 : vector<1x128xf32> to vector<8x128xf32>
    %95 = arith.addf %93, %94 : vector<8x128xf32>
    %cst_69 = arith.constant dense<0xFF800000> : vector<8xf32>
    %96 = vector.multi_reduction <maximumf>, %95, %cst_69 [1] : vector<8x128xf32> to vector<8xf32>
    %97 = vector.shape_cast %96 : vector<8xf32> to vector<8x1xf32>
    %98 = vector.broadcast %97 : vector<8x1xf32> to vector<8x128xf32>
    %99 = arith.subf %95, %98 : vector<8x128xf32>
    %100 = math.exp %99 : vector<8x128xf32>
    %cst_70 = arith.constant dense<0.000000e+00> : vector<8xf32>
    %101 = vector.multi_reduction <add>, %100, %cst_70 [1] : vector<8x128xf32> to vector<8xf32>
    %102 = vector.shape_cast %101 : vector<8xf32> to vector<8x1xf32>
    %103 = vector.broadcast %102 : vector<8x1xf32> to vector<8x128xf32>
    %104 = arith.divf %100, %103 : vector<8x128xf32>
    %c0_71 = arith.constant 0 : index
    %c0_72 = arith.constant 0 : index
    %105 = vector.load %arg7[%c0_71, %c0_72] : memref<8x128xf32, #tpu.memory_space<vmem>>, vector<8x128xf32>
    tpu.vector_store %arg7[%c0_71, %c0_72], %104 {strides = array<i32>} : memref<8x128xf32, #tpu.memory_space<vmem>>, vector<8x128xf32>,
    return
  }
}

</mosaic_0001>

<bundles_post_ra>
// kernel: policy_net_forward.1
= control target key start
LH: loop header
LB: loop body
LE: loop exit
PB: predicated region body
PF: predicated region fallthrough
CT: control target
= control target key end

     0   :  { %vm795_vm0 = vcmask 261120   ;;  %s3243_s18 = smov 32   ;;  %s3244_s19 = smov 64   ;;  %vm811_vm1 = vcmask 523520   ;;  %vm827_vm2 = vcmask 785920   ;;  %vm843_vm3 = vcmask 1048320   ;;  %s3974_s1 = inlined_call_operand.vmem [shape: bf16[256,32], index: 1, kind: input, shape index: {}]   ;;  %s3975_s0 = inlined_call_operand.vmem [shape: bf16[128,256], index: 0, kind: input, shape index: {}]   ;;  %s3976_s2 = inlined_call_operand.vmem [shape: bf16[456,128], index: 2, kind: input, shape index: {}]   ;;  %s3977_s6 = inlined_call_operand.vmem [shape: f32[8,512], index: 6, kind: input, shape index: {}]   ;;  %s3978_s3 = inlined_call_operand.vmem [shape: bf16[1088,64], index: 3, kind: input, shape index: {}]   ;;  %s3979_s4 = inlined_call_operand.vmem [shape: bf16[64,512], index: 4, kind: input, shape index: {}]   ;;  %s3980_s5 = inlined_call_operand.vmem [shape: bf16[512,128], index: 5, kind: input, shape index: {}]   ;;  %s3981_s7 = inlined_call_operand.vmem [shape: f32[8,128], index: 7, kind: output, shape index: {}]  }
   0x1   :  { %v3046_v0 = vld [vmem:[%s3974_s1 + $0x40] sm:$0xff]   ;;  %v3048_v2 = vld [vmem:[%s3974_s1 + $0x48] sm:$0xff]   ;;  %v3050_v4 = vld [vmem:[%s3974_s1 + $0x50] sm:$0xff]   ;;  %s3245_s26 = smov 96   ;;  %vm3247_vm4 = vmmov 0   ;;  %vm1416_vm5 = vcmask 1043456  }
   0x2   :  { %v3047_v1 = vld [vmem:[%s3974_s1] sm:$0xff]   ;;  %2688 = vmatprep.subr.bf16.mxu0 %v3046_v0  ;;  %v3049_v3 = vld [vmem:[%s3974_s1 + $0x8] sm:$0xff]   ;;  %v3051_v5 = vld [vmem:[%s3974_s1 + $0x10] sm:$0xff]   ;;  %vm1400_vm6 = vcmask 195584   ;;  %vm1492_vm7 = vcmask 523264   ;;  %vm1498_vm8 = vcmask 1048064  }
   0x3   :  { %2689 = vmatpush3.bf16.msra.mxu0 %v3047_v1  ;;  %v3052_v6 = vld [vmem:[%s3974_s1 + $0x58] sm:$0xff]   ;;  %v3054_v8 = vld [vmem:[%s3974_s1 + $0x60] sm:$0xff]   ;;  %v3056_v10 = vld [vmem:[%s3974_s1 + $0x68] sm:$0xff]  }
   0x4   :  { %2690 = vmatprep.subr.bf16.mxu0 %v3048_v2  ;;  %v3053_v7 = vld [vmem:[%s3974_s1 + $0x18] sm:$0xff]   ;;  %v3055_v9 = vld [vmem:[%s3974_s1 + $0x20] sm:$0xff]   ;;  %v3057_v12 = vld [vmem:[%s3974_s1 + $0x28] sm:$0xff]  }
   0x5   :  { %v3064_v11 = vld [vmem:[%s3975_s0 + $0x4] ss:$8 sps:$4 sm:$0xff]   ;;  %v3058_v13 = vld [vmem:[%s3974_s1 + $0x70] sm:$0xff]   ;;  %v3060_v15 = vld [vmem:[%s3974_s1 + $0x78] sm:$0xff]  }
   0x6   :  { %289 = vmatprep.mubr.bf16.mxu0 %v3064_v11  ;;  %v3059_v14 = vld [vmem:[%s3974_s1 + $0x30] sm:$0xff]   ;;  %v3061_v16 = vld [vmem:[%s3974_s1 + $0x38] sm:$0xff]   ;;  %v3062_v17 = vld [vmem:[%s3975_s0] ss:$8 sps:$4 sm:$0xff]  }
   0x7   :  { %2691 = vmatpush3.bf16.msra.mxu0 %v3049_v3  ;;  %v3065_v18 = vld [vmem:[%s3975_s0 + $0x14] ss:$8 sps:$4 sm:$0xff]   ;;  %v3067_v19 = vld [vmem:[%s3975_s0 + $0x10] ss:$8 sps:$4 sm:$0xff]   ;;  %v3068_v20 = vld [vmem:[%s3975_s0 + $0x24] ss:$8 sps:$4 sm:$0xff]  }
   0x8   :  { %2692 = vmatprep.subr.bf16.mxu0 %v3050_v4  ;;  %v3070_v21 = vld [vmem:[%s3975_s0 + $0x20] ss:$8 sps:$4 sm:$0xff]   ;;  %v3071_v22 = vld [vmem:[%s3975_s0 + $0x34] ss:$8 sps:$4 sm:$0xff]   ;;  %v3073_v23 = vld [vmem:[%s3975_s0 + $0x30] ss:$8 sps:$4 sm:$0xff]  }
   0x9   :  { %v3074_v24 = vld [vmem:[%s3975_s0 + $0x44] ss:$8 sps:$4 sm:$0xff]   ;;  %v3076_v25 = vld [vmem:[%s3975_s0 + $0x40] ss:$8 sps:$4 sm:$0xff]   ;;  %v3077_v26 = vld [vmem:[%s3975_s0 + $0x54] ss:$8 sps:$4 sm:$0xff]  }
   0xa   :  { %v3079_v27 = vld [vmem:[%s3975_s0 + $0x50] ss:$8 sps:$4 sm:$0xff]   ;;  %v3080_v28 = vld [vmem:[%s3975_s0 + $0x64] ss:$8 sps:$4 sm:$0xff]   ;;  %v3082_v29 = vld [vmem:[%s3975_s0 + $0x60] ss:$8 sps:$4 sm:$0xff]  }
   0xb   :  { %2693 = vmatpush3.bf16.msra.mxu0 %v3051_v5  ;;  %v3083_v30 = vld [vmem:[%s3975_s0 + $0x74] ss:$8 sps:$4 sm:$0xff]   ;;  %v3085_v31 = vld [vmem:[%s3975_s0 + $0x70] ss:$8 sps:$4 sm:$0xff]   ;;  %v3086_v32 = vld [vmem:[%s3976_s2] sm:$0xff]  }
   0xc   :  { %2694 = vmatprep.subr.bf16.mxu0 %v3052_v6  ;;  %2956 = vmatprep.mubr.bf16.mxu1 %v3086_v32  ;;  %v3391_v34 = vld [vmem:[%s3977_s6] ss:$0 sm:$0xff] }
   0xf   :  { %2695 = vmatpush3.bf16.msra.mxu0 %v3053_v7 }
  0x10   :  { %2696 = vmatprep.subr.bf16.mxu0 %v3054_v8 }
  0x13   :  { %2697 = vmatpush3.bf16.msra.mxu0 %v3055_v9 }
  0x14   :  { %2698 = vmatprep.subr.bf16.mxu0 %v3056_v10 }
  0x17   :  { %2699 = vmatpush3.bf16.msra.mxu0 %v3057_v12 }
  0x18   :  { %2700 = vmatprep.subr.bf16.mxu0 %v3058_v13 }
  0x1b   :  { %2701 = vmatpush3.bf16.msra.mxu0 %v3059_v14 }
  0x1c   :  { %2702 = vmatprep.subr.bf16.mxu0 %v3060_v15 }
  0x1f   :  { %2703 = vmatpush3.bf16.msra.mxu0 %v3061_v16 }
  0x22   :  { %290 = vmatmul.mubr.bf16.vlgmr.msra.gmra.mrb[0].mxu0 %v3062_v17 }
  0x23   :  { %297 = vmatprep.mubr.bf16.mxu0 %v3065_v18 }
  0x2a   :  { %298 = vmatmul.mubr.bf16.gmra.mrb[4].mxu0 %v3067_v19 }
  0x2b   :  { %305 = vmatprep.mubr.bf16.mxu0 %v3068_v20 }
  0x32   :  { %306 = vmatmul.mubr.bf16.gmra.mrb[8].mxu0 %v3070_v21 }
  0x33   :  { %313 = vmatprep.mubr.bf16.mxu0 %v3071_v22 }
  0x3a   :  { %314 = vmatmul.mubr.bf16.gmra.mrb[12].mxu0 %v3073_v23 }
  0x3b   :  { %321 = vmatprep.mubr.bf16.mxu0 %v3074_v24 }
  0x42   :  { %322 = vmatmul.mubr.bf16.gmra.mrb[16].mxu0 %v3076_v25 }
  0x43   :  { %329 = vmatprep.mubr.bf16.mxu0 %v3077_v26 }
  0x4a   :  { %330 = vmatmul.mubr.bf16.gmra.mrb[20].mxu0 %v3079_v27 }
  0x4b   :  { %337 = vmatprep.mubr.bf16.mxu0 %v3080_v28 }
  0x52   :  { %338 = vmatmul.mubr.bf16.gmra.mrb[24].mxu0 %v3082_v29 }
  0x53   :  { %345 = vmatprep.mubr.bf16.mxu0 %v3083_v30 }
  0x5a   :  { %346 = vmatmul.mubr.bf16.gmra.mrb[28].mxu0 %v3085_v31 }
  0xf5   :  { %v2704_v33 = vpop.f32.mrb[0].mxu0 }
  0xf6   :  { %v2705_v35 = vpop.f32.mrb[1].mxu0 }
  0xf7   :  { %v2706_v36 = vadd.f32 %v2705_v35, %v2704_v33  ;;  %v2707_v37 = vpop.f32.mrb[2].mxu0 }
  0xf8   :  { %v2708_v38 = vpop.f32.mrb[3].mxu0 }
  0xf9   :  { %v292_v39 = vadd.f32 %v2706_v36, %v3391_v34  ;;  %v2709_v40 = vadd.f32 %v2708_v38, %v2707_v37 }
  0xfb   :  { %v295_v41 = vadd.f32 %v2709_v40, %v3391_v34  ;;  %v354_v42 = vmax.f32 %v292_v39, 0.0 }
  0xfd   :  { %v355_v43 = vmax.f32 %v295_v41, 0.0  ;;  %v2710_v44 = vpop.f32.mrb[4].mxu0 }
  0xfe   :  { %v2711_v45 = vpop.f32.mrb[5].mxu0 }
  0xff   :  { %v2712_v46 = vadd.f32 %v2711_v45, %v2710_v44  ;;  %v2713_v47 = vpop.f32.mrb[6].mxu0  ;;  %v418_v48 = vpack.c.bf16 %v355_v43, %v354_v42 }
 0x100   :  { %v2714_v49 = vpop.f32.mrb[7].mxu0 }
 0x101   :  { %v300_v50 = vadd.f32 %v2712_v46, %v3391_v34  ;;  %v2715_v51 = vadd.f32 %v2714_v49, %v2713_v47  ;;  %2940 = vmatprep.subr.bf16.mxu1 %v418_v48 }
 0x102   :  { %2941 = vmatpush3.bf16.msra.mxu1 %v418_v48 }
 0x103   :  { %v303_v52 = vadd.f32 %v2715_v51, %v3391_v34  ;;  %v356_v53 = vmax.f32 %v300_v50, 0.0 }
 0x105   :  { %v357_v54 = vmax.f32 %v303_v52, 0.0  ;;  %v2716_v55 = vpop.f32.mrb[8].mxu0 }
 0x106   :  { %v2717_v56 = vpop.f32.mrb[9].mxu0 }
 0x107   :  { %v2718_v57 = vadd.f32 %v2717_v56, %v2716_v55  ;;  %v2719_v58 = vpop.f32.mrb[10].mxu0  ;;  %v419_v59 = vpack.c.bf16 %v357_v54, %v356_v53 }
 0x108   :  { %v2720_v60 = vpop.f32.mrb[11].mxu0 }
 0x109   :  { %v308_v61 = vadd.f32 %v2718_v57, %v3391_v34  ;;  %v2721_v62 = vadd.f32 %v2720_v60, %v2719_v58  ;;  %2942 = vmatprep.subr.bf16.mxu1 %v419_v59  ;;  %v3088_v60 = vld [vmem:[%s3976_s2 + $0x10] sm:$0xff]  }
 0x10a   :  { %2943 = vmatpush3.bf16.msra.mxu1 %v419_v59  ;;  %v3087_v59 = vld [vmem:[%s3976_s2 + $0x8] sm:$0xff]  }
 0x10b   :  { %v311_v63 = vadd.f32 %v2721_v62, %v3391_v34  ;;  %v358_v0 = vmax.f32 %v308_v61, 0.0  ;;  %v3089_v61 = vld [vmem:[%s3976_s2 + $0x18] sm:$0xff]   ;;  %v3091_v62 = vld [vmem:[%s3976_s2 + $0x28] sm:$0xff]  }
 0x10d   :  { %v359_v1 = vmax.f32 %v311_v63, 0.0  ;;  %v2722_v2 = vpop.f32.mrb[12].mxu0  ;;  %v3092_v63 = vld [vmem:[%s3976_s2 + $0x30] sm:$0xff]  }
 0x10e   :  { %v2723_v3 = vpop.f32.mrb[13].mxu0 }
 0x10f   :  { %v2724_v4 = vadd.f32 %v2723_v3, %v2722_v2  ;;  %v2725_v5 = vpop.f32.mrb[14].mxu0  ;;  %v420_v6 = vpack.c.bf16 %v359_v1, %v358_v0  ;;  %v3093_v0 = vld [vmem:[%s3976_s2 + $0x38] sm:$0xff]   ;;  %v3094_v1 = vld [vmem:[%s3976_s2 + $0x40] sm:$0xff]   ;;  %v3095_v2 = vld [vmem:[%s3976_s2 + $0x48] sm:$0xff]  }
 0x110   :  { %v2726_v7 = vpop.f32.mrb[15].mxu0  ;;  %v3096_v3 = vld [vmem:[%s3976_s2 + $0x50] sm:$0xff]  }
 0x111   :  { %v316_v8 = vadd.f32 %v2724_v4, %v3391_v34  ;;  %v2727_v9 = vadd.f32 %v2726_v7, %v2725_v5  ;;  %2944 = vmatprep.subr.bf16.mxu1 %v420_v6  ;;  %v3097_v4 = vld [vmem:[%s3976_s2 + $0x58] sm:$0xff]   ;;  %v3098_v5 = vld [vmem:[%s3976_s2 + $0x60] sm:$0xff]   ;;  %v3100_v7 = vld [vmem:[%s3976_s2 + $0x70] sm:$0xff]  }
 0x112   :  { %2945 = vmatpush3.bf16.msra.mxu1 %v420_v6  ;;  %v3099_v6 = vld [vmem:[%s3976_s2 + $0x68] sm:$0xff]  }
 0x113   :  { %v319_v10 = vadd.f32 %v2727_v9, %v3391_v34  ;;  %v360_v11 = vmax.f32 %v316_v8, 0.0  ;;  %v3101_v8 = vld [vmem:[%s3976_s2 + $0x78] sm:$0xff]   ;;  %v3102_v9 = vld [vmem:[%s3976_s2 + $0x80] sm:$0xff]  }
 0x115   :  { %v361_v12 = vmax.f32 %v319_v10, 0.0  ;;  %v2728_v13 = vpop.f32.mrb[16].mxu0  ;;  %v3103_v10 = vld [vmem:[%s3976_s2 + $0x88] sm:$0xff]  }
 0x116   :  { %v2729_v14 = vpop.f32.mrb[17].mxu0 }
 0x117   :  { %v2730_v15 = vadd.f32 %v2729_v14, %v2728_v13  ;;  %v2731_v16 = vpop.f32.mrb[18].mxu0  ;;  %v421_v17 = vpack.c.bf16 %v361_v12, %v360_v11  ;;  %v3104_v11 = vld [vmem:[%s3976_s2 + $0x90] sm:$0xff]   ;;  %v3105_v12 = vld [vmem:[%s3976_s2 + $0x98] sm:$0xff]   ;;  %v3106_v13 = vld [vmem:[%s3976_s2 + $0xa0] sm:$0xff]  }
 0x118   :  { %v2732_v18 = vpop.f32.mrb[19].mxu0  ;;  %v3107_v14 = vld [vmem:[%s3976_s2 + $0xa8] sm:$0xff]  }
 0x119   :  { %v324_v19 = vadd.f32 %v2730_v15, %v3391_v34  ;;  %v2733_v20 = vadd.f32 %v2732_v18, %v2731_v16  ;;  %2946 = vmatprep.subr.bf16.mxu1 %v421_v17  ;;  %v3108_v15 = vld [vmem:[%s3976_s2 + $0xb0] sm:$0xff]   ;;  %v3109_v16 = vld [vmem:[%s3976_s2 + $0xb8] sm:$0xff]  }
 0x11a   :  { %2947 = vmatpush3.bf16.msra.mxu1 %v421_v17 }
 0x11b   :  { %v327_v21 = vadd.f32 %v2733_v20, %v3391_v34  ;;  %v362_v22 = vmax.f32 %v324_v19, 0.0 }
 0x11d   :  { %v363_v23 = vmax.f32 %v327_v21, 0.0  ;;  %v2734_v24 = vpop.f32.mrb[20].mxu0 }
 0x11e   :  { %v2735_v25 = vpop.f32.mrb[21].mxu0 }
 0x11f   :  { %v2736_v26 = vadd.f32 %v2735_v25, %v2734_v24  ;;  %v2737_v27 = vpop.f32.mrb[22].mxu0  ;;  %v422_v28 = vpack.c.bf16 %v363_v23, %v362_v22  ;;  %v3110_v25 = vld [vmem:[%s3978_s3 + $0x40] sm:$0xff]  }
 0x120   :  { %v2738_v29 = vpop.f32.mrb[23].mxu0  ;;  %2784 = vmatprep.subr.bf16.mxu0 %v3110_v25 }
 0x121   :  { %v332_v30 = vadd.f32 %v2736_v26, %v3391_v34  ;;  %v2739_v31 = vadd.f32 %v2738_v29, %v2737_v27  ;;  %2948 = vmatprep.subr.bf16.mxu1 %v422_v28  ;;  %v3111_v26 = vld [vmem:[%s3978_s3] sm:$0xff]   ;;  %v3112_v27 = vld [vmem:[%s3978_s3 + $0x48] sm:$0xff]  }
 0x122   :  { %2949 = vmatpush3.bf16.msra.mxu1 %v422_v28  ;;  %2785 = vmatpush3.bf16.msra.mxu0 %v3111_v26 }
 0x123   :  { %v335_v32 = vadd.f32 %v2739_v31, %v3391_v34  ;;  %v364_v33 = vmax.f32 %v332_v30, 0.0  ;;  %2786 = vmatprep.subr.bf16.mxu0 %v3112_v27  ;;  %v3113_v31 = vld [vmem:[%s3978_s3 + $0x8] sm:$0xff]  }
 0x125   :  { %v365_v35 = vmax.f32 %v335_v32, 0.0  ;;  %v2740_v36 = vpop.f32.mrb[24].mxu0 }
 0x126   :  { %v2741_v37 = vpop.f32.mrb[25].mxu0  ;;  %2787 = vmatpush3.bf16.msra.mxu0 %v3113_v31 }
 0x127   :  { %v2742_v38 = vadd.f32 %v2741_v37, %v2740_v36  ;;  %v2743_v39 = vpop.f32.mrb[26].mxu0  ;;  %v423_v40 = vpack.c.bf16 %v365_v35, %v364_v33  ;;  %v3114_v33 = vld [vmem:[%s3978_s3 + $0x50] sm:$0xff]  }
 0x128   :  { %v2744_v41 = vpop.f32.mrb[27].mxu0  ;;  %v3115_v35 = vld [vmem:[%s3978_s3 + $0x10] sm:$0xff]   ;;  %2788 = vmatprep.subr.bf16.mxu0 %v3114_v33 }
 0x129   :  { %v340_v42 = vadd.f32 %v2742_v38, %v3391_v34  ;;  %v2745_v43 = vadd.f32 %v2744_v41, %v2743_v39  ;;  %2950 = vmatprep.subr.bf16.mxu1 %v423_v40  ;;  %v3116_v38 = vld [vmem:[%s3978_s3 + $0x58] sm:$0xff]  }
 0x12a   :  { %2951 = vmatpush3.bf16.msra.mxu1 %v423_v40  ;;  %2789 = vmatpush3.bf16.msra.mxu0 %v3115_v35  ;;  %v3117_v40 = vld [vmem:[%s3978_s3 + $0x18] sm:$0xff]  }
 0x12b   :  { %v343_v44 = vadd.f32 %v2745_v43, %v3391_v34  ;;  %v366_v45 = vmax.f32 %v340_v42, 0.0  ;;  %2790 = vmatprep.subr.bf16.mxu0 %v3116_v38  ;;  %v3118_v42 = vld [vmem:[%s3978_s3 + $0x60] sm:$0xff]  }
 0x12c   :  { %v3119_v43 = vld [vmem:[%s3978_s3 + $0x20] sm:$0xff]  }
 0x12d   :  { %v367_v46 = vmax.f32 %v343_v44, 0.0  ;;  %v2746_v47 = vpop.f32.mrb[28].mxu0 }
 0x12e   :  { %v2747_v48 = vpop.f32.mrb[29].mxu0  ;;  %2791 = vmatpush3.bf16.msra.mxu0 %v3117_v40 }
 0x12f   :  { %v2748_v49 = vadd.f32 %v2747_v48, %v2746_v47  ;;  %v2749_v50 = vpop.f32.mrb[30].mxu0  ;;  %v424_v51 = vpack.c.bf16 %v367_v46, %v366_v45  ;;  %2792 = vmatprep.subr.bf16.mxu0 %v3118_v42  ;;  %v3120_v45 = vld [vmem:[%s3978_s3 + $0x68] sm:$0xff]  }
 0x130   :  { %v2750_v52 = vpop.f32.mrb[31].mxu0  ;;  %v3121_v48 = vld [vmem:[%s3978_s3 + $0x28] sm:$0xff]  }
 0x131   :  { %v348_v53 = vadd.f32 %v2748_v49, %v3391_v34  ;;  %v2751_v54 = vadd.f32 %v2750_v52, %v2749_v50  ;;  %2952 = vmatprep.subr.bf16.mxu1 %v424_v51  ;;  %v3122_v50 = vld [vmem:[%s3978_s3 + $0x70] sm:$0xff]  }
 0x132   :  { %2953 = vmatpush3.bf16.msra.mxu1 %v424_v51  ;;  %2793 = vmatpush3.bf16.msra.mxu0 %v3119_v43  ;;  %v3123_v51 = vld [vmem:[%s3978_s3 + $0x30] sm:$0xff]  }
 0x133   :  { %v351_v55 = vadd.f32 %v2751_v54, %v3391_v34  ;;  %v368_v56 = vmax.f32 %v348_v53, 0.0  ;;  %v3090_v34 = vld [vmem:[%s3976_s2 + $0x20] sm:$0xff]   ;;  %2794 = vmatprep.subr.bf16.mxu0 %v3120_v45  ;;  %v3124_v53 = vld [vmem:[%s3978_s3 + $0x78] sm:$0xff]  }
 0x135   :  { %v369_v57 = vmax.f32 %v351_v55, 0.0 }
 0x136   :  { %2795 = vmatpush3.bf16.msra.mxu0 %v3121_v48 }
 0x137   :  { %v425_v58 = vpack.c.bf16 %v369_v57, %v368_v56  ;;  %2796 = vmatprep.subr.bf16.mxu0 %v3122_v50  ;;  %v3125_v56 = vld [vmem:[%s3978_s3 + $0x38] sm:$0xff]  }
 0x139   :  { %2954 = vmatprep.subr.bf16.mxu1 %v425_v58 }
 0x13a   :  { %2955 = vmatpush3.bf16.msra.mxu1 %v425_v58  ;;  %2797 = vmatpush3.bf16.msra.mxu0 %v3123_v51  ;;  %v3129_v51 = vld [vmem:[%s3978_s3 + $0x88] sm:$0xff]  }
 0x13b   :  { %2798 = vmatprep.subr.bf16.mxu0 %v3124_v53 }
 0x13d   :  { %2957 = vmatmul.mubr.bf16.vlgmr.msra.gmra.mrb[0].mxu1 %v3087_v59 }
 0x13e   :  { %2960 = vmatprep.mubr.bf16.mxu1 %v3088_v60  ;;  %2799 = vmatpush3.bf16.msra.mxu0 %v3125_v56 }
 0x145   :  { %2961 = vmatmul.mubr.bf16.gmra.mrb[4].mxu1 %v3089_v61 }
 0x146   :  { %2964 = vmatprep.mubr.bf16.mxu1 %v3090_v34  ;;  %v3126_v34 = vld [vmem:[%s3978_s3 + $0xc0] sm:$0xff]  }
 0x147   :  { %2812 = vmatprep.subr.bf16.mxu0 %v3126_v34 }
 0x14d   :  { %2965 = vmatmul.mubr.bf16.gmra.mrb[8].mxu1 %v3091_v62 }
 0x14e   :  { %2968 = vmatprep.mubr.bf16.mxu1 %v3092_v63 }
 0x155   :  { %2969 = vmatmul.mubr.bf16.gmra.mrb[12].mxu1 %v3093_v0 }
 0x156   :  { %2972 = vmatprep.mubr.bf16.mxu1 %v3094_v1 }
 0x15d   :  { %2973 = vmatmul.mubr.bf16.gmra.mrb[16].mxu1 %v3095_v2 }
 0x15e   :  { %2976 = vmatprep.mubr.bf16.mxu1 %v3096_v3 }
 0x165   :  { %2977 = vmatmul.mubr.bf16.gmra.mrb[20].mxu1 %v3097_v4 }
 0x166   :  { %2980 = vmatprep.mubr.bf16.mxu1 %v3098_v5 }
 0x16d   :  { %2981 = vmatmul.mubr.bf16.gmra.mrb[24].mxu1 %v3099_v6 }
 0x16e   :  { %2984 = vmatprep.mubr.bf16.mxu1 %v3100_v7 }
 0x175   :  { %2985 = vmatmul.mubr.bf16.gmra.mrb[28].mxu1 %v3101_v8 }
 0x176   :  { %2988 = vmatprep.mubr.bf16.mxu1 %v3102_v9 }
 0x17d   :  { %2989 = vmatmul.mubr.bf16.gmra.mrb[32].mxu1 %v3103_v10 }
 0x17e   :  { %2992 = vmatprep.mubr.bf16.mxu1 %v3104_v11 }
 0x185   :  { %2993 = vmatmul.mubr.bf16.gmra.mrb[36].mxu1 %v3105_v12 }
 0x186   :  { %2996 = vmatprep.mubr.bf16.mxu1 %v3106_v13 }
 0x18d   :  { %2997 = vmatmul.mubr.bf16.gmra.mrb[40].mxu1 %v3107_v14 }
 0x18e   :  { %3000 = vmatprep.mubr.bf16.mxu1 %v3108_v15 }
 0x195   :  { %3001 = vmatmul.mubr.bf16.gmra.mrb[44].mxu1 %v3109_v16 }
 0x210   :  { %v2958_v17 = vpop.f32.mrb[0].mxu1 }
 0x211   :  { %798 = vst.msk [vmem:[#allocation2 + $0x40] sm:$0xff] %vm795_vm0, %v2958_v17  ;;  %v604_v18 = vpop.f32.mrb[1].mxu1 }
 0x212   :  { %796 = vst.msk [vmem:[#allocation2] sm:$0xff] %vm795_vm0, %v604_v18  ;;  %v2959_v19 = vpop.f32.mrb[2].mxu1 }
 0x213   :  { %802 = vrot.lane.b32.xlu1 %v2959_v19, %s3243_s18  ;;  %v607_v20 = vpop.f32.mrb[3].mxu1 }
 0x214   :  { %797 = vst.msk [vmem:[#allocation2 + $0x20] sm:$0xff] %vm795_vm0, %v607_v20 }
 0x218   :  { %v2962_v21 = vpop.f32.mrb[4].mxu1 }
 0x219   :  { %818 = vrot.lane.b32.xlu0 %v2962_v21, %s3244_s19  ;;  %v620_v22 = vpop.f32.mrb[5].mxu1 }
 0x21a   :  { %804 = vrot.lane.b32.xlu1 %v620_v22, %s3243_s18  ;;  %v2963_v23 = vpop.f32.mrb[6].mxu1 }
 0x21b   :  { %v623_v24 = vpop.f32.mrb[7].mxu1 }
 0x21e   :  { %820 = vrot.lane.b32.xlu1 %v2963_v23, %s3244_s19 }
 0x220   :  { %v2966_v28 = vpop.f32.mrb[8].mxu1 }
 0x221   :  { %v636_v29 = vpop.f32.mrb[9].mxu1 }
 0x222   :  { %806 = vrot.lane.b32.xlu1 %v623_v24, %s3243_s18  ;;  %v2967_v30 = vpop.f32.mrb[10].mxu1 }
 0x223   :  { %v639_v32 = vpop.f32.mrb[11].mxu1 }
 0x224   :  { %834 = vrot.lane.b32.xlu0 %v639_v32, %s3245_s26 }
 0x226   :  { %836 = vrot.lane.b32.xlu1 %v2966_v28, %s3245_s26 }
 0x228   :  { %v2970_v36 = vpop.f32.mrb[12].mxu1 }
 0x229   :  { %849 = vst.msk [vmem:[#allocation2 + $0x48] sm:$0xff] %vm795_vm0, %v2970_v36  ;;  %v652_v37 = vpop.f32.mrb[13].mxu1 }
 0x22a   :  { %847 = vst.msk [vmem:[#allocation2 + $0x8] sm:$0xff] %vm795_vm0, %v652_v37  ;;  %822 = vrot.lane.b32.xlu1 %v636_v29, %s3244_s19  ;;  %v2971_v39 = vpop.f32.mrb[14].mxu1 }
 0x22b   :  { %853 = vrot.lane.b32.xlu0 %v2971_v39, %s3243_s18  ;;  %v655_v41 = vpop.f32.mrb[15].mxu1 }
 0x22c   :  { %848 = vst.msk [vmem:[#allocation2 + $0x28] sm:$0xff] %vm795_vm0, %v655_v41 }
 0x230   :  { %v2974_v44 = vpop.f32.mrb[16].mxu1 }
 0x231   :  { %868 = vrot.lane.b32.xlu0 %v2974_v44, %s3244_s19  ;;  %v668_v46 = vpop.f32.mrb[17].mxu1  ;;  %v3127_v44 = vld [vmem:[%s3978_s3 + $0x80] sm:$0xff]  }
 0x232   :  { %v2975_v47 = vpop.f32.mrb[18].mxu1 }
 0x233   :  { %870 = vrot.lane.b32.xlu1 %v2975_v47, %s3244_s19  ;;  %v671_v49 = vpop.f32.mrb[19].mxu1 }
 0x235   :  { %855 = vrot.lane.b32.xlu0 %v668_v46, %s3243_s18  ;;  %v3128_v46 = vld [vmem:[%s3978_s3 + $0xc8] sm:$0xff]  }
 0x238   :  { %v2978_v52 = vpop.f32.mrb[20].mxu1 }
 0x239   :  { %857 = vrot.lane.b32.xlu0 %v671_v49, %s3243_s18  ;;  %885 = vrot.lane.b32.xlu1 %v2978_v52, %s3245_s26  ;;  %v684_v54 = vpop.f32.mrb[21].mxu1  ;;  %v3130_v52 = vld [vmem:[%s3978_s3 + $0xd0] sm:$0xff]  }
 0x23a   :  { %v2979_v55 = vpop.f32.mrb[22].mxu1 }
 0x23b   :  { %v687_v57 = vpop.f32.mrb[23].mxu1 }
 0x23d   :  { %838 = vrot.lane.b32.xlu1 %v2967_v30, %s3245_s26  ;;  %872 = vrot.lane.b32.xlu0 %v684_v54, %s3244_s19 }
 0x240   :  { %v2982_v58 = vpop.f32.mrb[24].mxu1 }
 0x241   :  { %897 = vst.msk [vmem:[#allocation2 + $0x50] sm:$0xff] %vm795_vm0, %v2982_v58  ;;  %883 = vrot.lane.b32.xlu0 %v687_v57, %s3245_s26  ;;  %v700_v59 = vpop.f32.mrb[25].mxu1  ;;  %v3132_v57 = vld [vmem:[%s3978_s3 + $0xd8] sm:$0xff]  }
 0x242   :  { %895 = vst.msk [vmem:[#allocation2 + $0x10] sm:$0xff] %vm795_vm0, %v700_v59  ;;  %v2983_v60 = vpop.f32.mrb[26].mxu1  ;;  %v3133_v59 = vld [vmem:[%s3978_s3 + $0x98] sm:$0xff]  }
 0x243   :  { %v703_v61 = vpop.f32.mrb[27].mxu1 }
 0x244   :  { %896 = vst.msk [vmem:[#allocation2 + $0x30] sm:$0xff] %vm795_vm0, %v703_v61  ;;  %v3135_v61 = vld [vmem:[%s3978_s3 + $0xa0] sm:$0xff]  }
 0x245   :  { %887 = vrot.lane.b32.xlu0 %v2979_v55, %s3245_s26  ;;  %v3131_v55 = vld [vmem:[%s3978_s3 + $0x90] sm:$0xff]  }
 0x248   :  { %v2986_v62 = vpop.f32.mrb[28].mxu1 }
 0x249   :  { %901 = vrot.lane.b32.xlu0 %v2983_v60, %s3243_s18  ;;  %v716_v63 = vpop.f32.mrb[29].mxu1  ;;  %v3134_v60 = vld [vmem:[%s3978_s3 + $0xe0] sm:$0xff]  }
 0x24a   :  { %903 = vrot.lane.b32.xlu1 %v716_v63, %s3243_s18  ;;  %v2987_v0 = vpop.f32.mrb[30].mxu1  ;;  %v3137_v63 = vld [vmem:[%s3978_s3 + $0xa8] sm:$0xff]  }
 0x24b   :  { %v719_v1 = vpop.f32.mrb[31].mxu1 }
 0x24d   :  { %916 = vrot.lane.b32.xlu0 %v2986_v62, %s3244_s19  ;;  %v3136_v62 = vld [vmem:[%s3978_s3 + $0xe8] sm:$0xff]  }
 0x24e   :  { %918 = vrot.lane.b32.xlu1 %v2987_v0, %s3244_s19  ;;  %v3138_v0 = vld [vmem:[%s3978_s3 + $0xf0] sm:$0xff]  }
 0x250   :  { %v2990_v2 = vpop.f32.mrb[32].mxu1 }
 0x251   :  { %v732_v3 = vpop.f32.mrb[33].mxu1 }
 0x252   :  { %933 = vrot.lane.b32.xlu1 %v2990_v2, %s3245_s26  ;;  %v2991_v4 = vpop.f32.mrb[34].mxu1 }
 0x253   :  { %v735_v5 = vpop.f32.mrb[35].mxu1 }
 0x254   :  { %931 = vrot.lane.b32.xlu0 %v735_v5, %s3245_s26 }
 0x258   :  { %v2994_v6 = vpop.f32.mrb[36].mxu1 }
 0x259   :  { %945 = vst.msk [vmem:[#allocation2 + $0x58] sm:$0xff] %vm795_vm0, %v2994_v6  ;;  %v748_v7 = vpop.f32.mrb[37].mxu1 }
 0x25a   :  { %943 = vst.msk [vmem:[#allocation2 + $0x18] sm:$0xff] %vm795_vm0, %v748_v7  ;;  %v2995_v8 = vpop.f32.mrb[38].mxu1  ;;  %v3141_v7 = vld [vmem:[%s3978_s3 + $0xb8] sm:$0xff]  }
 0x25b   :  { %949 = vrot.lane.b32.xlu0 %v2995_v8, %s3243_s18  ;;  %v751_v9 = vpop.f32.mrb[39].mxu1 }
 0x25c   :  { %944 = vst.msk [vmem:[#allocation2 + $0x38] sm:$0xff] %vm795_vm0, %v751_v9 }
 0x260   :  { %v2998_v10 = vpop.f32.mrb[40].mxu1 }
 0x261   :  { %964 = vrot.lane.b32.xlu0 %v2998_v10, %s3244_s19  ;;  %v764_v11 = vpop.f32.mrb[41].mxu1 }
 0x262   :  { %951 = vrot.lane.b32.xlu1 %v764_v11, %s3243_s18  ;;  %v2999_v12 = vpop.f32.mrb[42].mxu1 }
 0x263   :  { %v767_v13 = vpop.f32.mrb[43].mxu1 }
 0x265   :  { %953 = vrot.lane.b32.xlu0 %v767_v13, %s3243_s18 }
 0x266   :  { %966 = vrot.lane.b32.xlu1 %v2999_v12, %s3244_s19 }
 0x268   :  { %v3002_v14 = vpop.f32.mrb[44].mxu1 }
 0x269   :  { %v780_v15 = vpop.f32.mrb[45].mxu1 }
 0x26a   :  { %981 = vrot.lane.b32.xlu1 %v3002_v14, %s3245_s26  ;;  %v3003_v16 = vpop.f32.mrb[46].mxu1 }
 0x26b   :  { %v783_v17 = vpop.f32.mrb[47].mxu1 }
 0x26c   :  { %979 = vrot.lane.b32.xlu0 %v783_v17, %s3245_s26 }
 0x26e   :  { %905 = vrot.lane.b32.xlu1 %v719_v1, %s3243_s18 }
 0x270   :  { %968 = vrot.lane.b32.xlu0 %v780_v15, %s3244_s19 }
 0x272   :  { %920 = vrot.lane.b32.xlu1 %v732_v3, %s3244_s19  ;;  %v3139_v3 = vld [vmem:[%s3978_s3 + $0xb0] sm:$0xff]  }
 0x274   :  { %983 = vrot.lane.b32.xlu0 %v3003_v16, %s3245_s26 }
 0x276   :  { %935 = vrot.lane.b32.xlu1 %v2991_v4, %s3245_s26  ;;  %v3140_v4 = vld [vmem:[%s3978_s3 + $0xf8] sm:$0xff]  }
 0x285   :  { %v803_v18 = vpop.permute.xlu1 %802 }
 0x286   :  { %812 = vst.msk [vmem:[#allocation2] sm:$0xff] %vm811_vm1, %v803_v18 }
 0x28b   :  { %v819_v19 = vpop.permute.xlu0 %818 }
 0x28c   :  { %828 = vst.msk [vmem:[#allocation2] sm:$0xff] %vm827_vm2, %v819_v19  ;;  %v805_v20 = vpop.permute.xlu1 %804 }
 0x28d   :  { %813 = vst.msk [vmem:[#allocation2 + $0x20] sm:$0xff] %vm811_vm1, %v805_v20 }
 0x290   :  { %v821_v21 = vpop.permute.xlu1 %820 }
 0x291   :  { %829 = vst.msk [vmem:[#allocation2 + $0x20] sm:$0xff] %vm827_vm2, %v821_v21 }
 0x294   :  { %v807_v22 = vpop.permute.xlu1 %806 }
 0x295   :  { %814 = vst.msk [vmem:[#allocation2 + $0x40] sm:$0xff] %vm811_vm1, %v807_v22 }
 0x296   :  { %v835_v23 = vpop.permute.xlu0 %834 }
 0x297   :  { %844 = vst.msk [vmem:[#allocation2] sm:$0xff] %vm843_vm3, %v835_v23 }
 0x298   :  { %v837_v24 = vpop.permute.xlu1 %836 }
 0x299   :  { %845 = vst.msk [vmem:[#allocation2 + $0x20] sm:$0xff] %vm843_vm3, %v837_v24 }
 0x29c   :  { %v823_v25 = vpop.permute.xlu1 %822 }
 0x29d   :  { %830 = vst.msk [vmem:[#allocation2 + $0x40] sm:$0xff] %vm827_vm2, %v823_v25  ;;  %v854_v26 = vpop.permute.xlu0 %853  ;;  %v3246_v25 = vmov 0.0  }
 0x29e   :  { %862 = vst.msk [vmem:[#allocation2 + $0x8] sm:$0xff] %vm811_vm1, %v854_v26  ;;  %v1055_v43 = vld [vmem:[#allocation2] sm:$0xff]  ;;  %3004 = vmatprep.subr.bf16.mxu1 %v3246_v25  ;;  %3008 = vmatprep.mubr.msk.bf16.mxu1 %vm3247_vm4, %v3246_v25 }
 0x2a0   :  { %v1059_v37 = vld [vmem:[#allocation2 + $0x20] sm:$0xff] }
 0x2a1   :  { %v1067_v45 = vpack.c.bf16 %v1059_v37, %v1055_v43 }
 0x2a3   :  { %v869_v27 = vpop.permute.xlu0 %868 }
 0x2a4   :  { %877 = vst.msk [vmem:[#allocation2 + $0x8] sm:$0xff] %vm827_vm2, %v869_v27 }
 0x2a5   :  { %v871_v28 = vpop.permute.xlu1 %870 }
 0x2a7   :  { %v856_v29 = vpop.permute.xlu0 %855 }
 0x2a8   :  { %863 = vst.msk [vmem:[#allocation2 + $0x28] sm:$0xff] %vm811_vm1, %v856_v29 }
 0x2a9   :  { %878 = vst.msk [vmem:[#allocation2 + $0x28] sm:$0xff] %vm827_vm2, %v871_v28 }
 0x2ab   :  { %v858_v30 = vpop.permute.xlu0 %857  ;;  %v886_v31 = vpop.permute.xlu1 %885 }
 0x2ac   :  { %864 = vst.msk [vmem:[#allocation2 + $0x48] sm:$0xff] %vm811_vm1, %v858_v30 }
 0x2ad   :  { %893 = vst.msk [vmem:[#allocation2 + $0x28] sm:$0xff] %vm843_vm3, %v886_v31 }
 0x2af   :  { %v839_v32 = vpop.permute.xlu1 %838  ;;  %v873_v33 = vpop.permute.xlu0 %872 }
 0x2b0   :  { %846 = vst.msk [vmem:[#allocation2 + $0x40] sm:$0xff] %vm843_vm3, %v839_v32 }
 0x2b1   :  { %879 = vst.msk [vmem:[#allocation2 + $0x48] sm:$0xff] %vm827_vm2, %v873_v33 }
 0x2b3   :  { %v884_v35 = vpop.permute.xlu0 %883 }
 0x2b4   :  { %892 = vst.msk [vmem:[#allocation2 + $0x8] sm:$0xff] %vm843_vm3, %v884_v35  ;;  %v1060_v40 = vld [vmem:[#allocation2 + $0x28] sm:$0xff] }
 0x2b7   :  { %v888_v36 = vpop.permute.xlu0 %887  ;;  %v1063_v53 = vld [vmem:[#allocation2 + $0x40] sm:$0xff] }
 0x2b8   :  { %894 = vst.msk [vmem:[#allocation2 + $0x48] sm:$0xff] %vm843_vm3, %v888_v36  ;;  %v1071_v56 = vpack.c.bf16 %v1063_v53, %v1063_v53 }
 0x2bb   :  { %v902_v38 = vpop.permute.xlu0 %901  ;;  %v1056_v39 = vld [vmem:[#allocation2 + $0x8] sm:$0xff] }
 0x2bc   :  { %910 = vst.msk [vmem:[#allocation2 + $0x10] sm:$0xff] %vm811_vm1, %v902_v38  ;;  %v904_v41 = vpop.permute.xlu1 %903  ;;  %v1068_v42 = vpack.c.bf16 %v1060_v40, %v1056_v39  ;;  %v28_v38 = vld [vmem:[%s3977_s6 + $0x1] ss:$0 sm:$0xff] }
 0x2bd   :  { %911 = vst.msk [vmem:[#allocation2 + $0x30] sm:$0xff] %vm811_vm1, %v904_v41 }
 0x2be   :  { %1299 = vmatprep.mubr.bf16.mxu0 %v1068_v42 }
 0x2bf   :  { %1300 = vmatmul.mubr.bf16.vlgmr.msra.gmra.mrb[32].mxu0 %v1067_v45  ;;  %v917_v47 = vpop.permute.xlu0 %916  ;;  %v1064_v48 = vld [vmem:[#allocation2 + $0x48] sm:$0xff] }
 0x2c0   :  { %925 = vst.msk [vmem:[#allocation2 + $0x10] sm:$0xff] %vm827_vm2, %v917_v47  ;;  %v919_v49 = vpop.permute.xlu1 %918  ;;  %v1072_v50 = vpack.c.bf16 %v1064_v48, %v1064_v48  ;;  %2813 = vmatpush3.bf16.msra.mxu0 %v3127_v44 }
 0x2c1   :  { %926 = vst.msk [vmem:[#allocation2 + $0x30] sm:$0xff] %vm827_vm2, %v919_v49  ;;  %2814 = vmatprep.subr.bf16.mxu0 %v3128_v46 }
 0x2c2   :  { %1307 = vmatprep.mubr.bf16.mxu0 %v1072_v50 }
 0x2c4   :  { %v934_v54 = vpop.permute.xlu1 %933  ;;  %2815 = vmatpush3.bf16.msra.mxu0 %v3129_v51 }
 0x2c5   :  { %941 = vst.msk [vmem:[#allocation2 + $0x30] sm:$0xff] %vm843_vm3, %v934_v54  ;;  %2816 = vmatprep.subr.bf16.mxu0 %v3130_v52 }
 0x2c6   :  { %v932_v58 = vpop.permute.xlu0 %931 }
 0x2c7   :  { %940 = vst.msk [vmem:[#allocation2 + $0x10] sm:$0xff] %vm843_vm3, %v932_v58  ;;  %1308 = vmatmul.mubr.bf16.gmra.mrb[36].mxu0 %v1071_v56 }
 0x2c8   :  { %2817 = vmatpush3.bf16.msra.mxu0 %v3131_v55 }
 0x2c9   :  { %2818 = vmatprep.subr.bf16.mxu0 %v3132_v57 }
 0x2cc   :  { %2819 = vmatpush3.bf16.msra.mxu0 %v3133_v59  ;;  %v1061_v18 = vld [vmem:[#allocation2 + $0x30] sm:$0xff] }
 0x2cd   :  { %v950_v34 = vpop.permute.xlu0 %949  ;;  %2820 = vmatprep.subr.bf16.mxu0 %v3134_v60 }
 0x2ce   :  { %958 = vst.msk [vmem:[#allocation2 + $0x18] sm:$0xff] %vm811_vm1, %v950_v34  ;;  %v1057_v13 = vld [vmem:[#allocation2 + $0x10] sm:$0xff]  ;;  %v3142_v34 = vld [vmem:[%s3976_s2 + $0xc0] sm:$0xff]  }
 0x2cf   :  { %v1069_v20 = vpack.c.bf16 %v1061_v18, %v1057_v13  ;;  %v3154_v13 = vld [vmem:[%s3978_s3 + $0x158] sm:$0xff]   ;;  %v3162_v18 = vld [vmem:[%s3978_s3 + $0x168] sm:$0xff]  }
 0x2d0   :  { %2821 = vmatpush3.bf16.msra.mxu0 %v3135_v61 }
 0x2d1   :  { %2822 = vmatprep.subr.bf16.mxu0 %v3136_v62  ;;  %v3143_v62 = vld [vmem:[%s3976_s2 + $0xc8] sm:$0xff]  }
 0x2d3   :  { %v965_v1 = vpop.permute.xlu0 %964 }
 0x2d4   :  { %973 = vst.msk [vmem:[#allocation2 + $0x18] sm:$0xff] %vm827_vm2, %v965_v1  ;;  %v952_v2 = vpop.permute.xlu1 %951  ;;  %2823 = vmatpush3.bf16.msra.mxu0 %v3137_v63  ;;  %v3144_v63 = vld [vmem:[%s3976_s2 + $0xd0] sm:$0xff]   ;;  %v3146_v1 = vld [vmem:[%s3976_s2 + $0xe0] ss:$0 sps:$4 sm:$0xff]  }
 0x2d5   :  { %959 = vst.msk [vmem:[#allocation2 + $0x38] sm:$0xff] %vm811_vm1, %v952_v2  ;;  %2824 = vmatprep.subr.bf16.mxu0 %v3138_v0  ;;  %v3145_v0 = vld [vmem:[%s3976_s2 + $0xd8] sm:$0xff]   ;;  %v3147_v2 = vld [vmem:[%s3978_s3 + $0x140] sm:$0xff]  }
 0x2d7   :  { %v954_v5 = vpop.permute.xlu0 %953 }
 0x2d8   :  { %960 = vst.msk [vmem:[#allocation2 + $0x58] sm:$0xff] %vm811_vm1, %v954_v5  ;;  %v967_v6 = vpop.permute.xlu1 %966  ;;  %2825 = vmatpush3.bf16.msra.mxu0 %v3139_v3  ;;  %v3148_v3 = vld [vmem:[%s3978_s3 + $0x100] sm:$0xff]  }
 0x2d9   :  { %974 = vst.msk [vmem:[#allocation2 + $0x38] sm:$0xff] %vm827_vm2, %v967_v6  ;;  %2826 = vmatprep.subr.bf16.mxu0 %v3140_v4  ;;  %v3149_v4 = vld [vmem:[%s3978_s3 + $0x148] sm:$0xff]   ;;  %v3153_v5 = vld [vmem:[%s3978_s3 + $0x1c0] sm:$0xff]  }
 0x2da   :  { %v3155_v6 = vld [vmem:[%s3978_s3 + $0x180] sm:$0xff]  }
 0x2dc   :  { %v982_v8 = vpop.permute.xlu1 %981  ;;  %2827 = vmatpush3.bf16.msra.mxu0 %v3141_v7  ;;  %v3150_v7 = vld [vmem:[%s3978_s3 + $0x108] sm:$0xff]  }
 0x2dd   :  { %989 = vst.msk [vmem:[#allocation2 + $0x38] sm:$0xff] %vm843_vm3, %v982_v8  ;;  %2847 = vmatprep.subr.bf16.mxu0 %v3147_v2  ;;  %v3157_v8 = vld [vmem:[%s3978_s3 + $0x1c8] sm:$0xff]   ;;  %v3181_v2 = vld [vmem:[%s3978_s3 + $0x210] sm:$0xff]  }
 0x2de   :  { %v980_v9 = vpop.permute.xlu0 %979 }
 0x2df   :  { %988 = vst.msk [vmem:[#allocation2 + $0x18] sm:$0xff] %vm843_vm3, %v980_v9  ;;  %v3151_v9 = vld [vmem:[%s3978_s3 + $0x150] sm:$0xff]  }
 0x2e0   :  { %v906_v10 = vpop.permute.xlu1 %905 }
 0x2e1   :  { %912 = vst.msk [vmem:[#allocation2 + $0x50] sm:$0xff] %vm811_vm1, %v906_v10  ;;  %v3159_v10 = vld [vmem:[%s3978_s3 + $0x188] sm:$0xff]  }
 0x2e2   :  { %v969_v11 = vpop.permute.xlu0 %968 }
 0x2e3   :  { %975 = vst.msk [vmem:[#allocation2 + $0x58] sm:$0xff] %vm827_vm2, %v969_v11  ;;  %v3161_v11 = vld [vmem:[%s3978_s3 + $0x1d0] sm:$0xff]  }
 0x2e4   :  { %v921_v12 = vpop.permute.xlu1 %920  ;;  %v1062_v16 = vld [vmem:[#allocation2 + $0x38] sm:$0xff] }
 0x2e5   :  { %927 = vst.msk [vmem:[#allocation2 + $0x50] sm:$0xff] %vm827_vm2, %v921_v12  ;;  %v3152_v12 = vld [vmem:[%s3978_s3 + $0x110] sm:$0xff]  }
 0x2e6   :  { %v984_v14 = vpop.permute.xlu0 %983  ;;  %v1058_v15 = vld [vmem:[#allocation2 + $0x18] sm:$0xff] }
 0x2e7   :  { %990 = vst.msk [vmem:[#allocation2 + $0x58] sm:$0xff] %vm843_vm3, %v984_v14  ;;  %v1070_v17 = vpack.c.bf16 %v1062_v16, %v1058_v15  ;;  %v3163_v14 = vld [vmem:[%s3978_s3 + $0x190] sm:$0xff]   ;;  %v3156_v15 = vld [vmem:[%s3978_s3 + $0x118] sm:$0xff]   ;;  %v3158_v16 = vld [vmem:[%s3978_s3 + $0x160] sm:$0xff]  }
 0x2e8   :  { %v936_v19 = vpop.permute.xlu1 %935 }
 0x2e9   :  { %942 = vst.msk [vmem:[#allocation2 + $0x50] sm:$0xff] %vm843_vm3, %v936_v19  ;;  %1347 = vmatprep.mubr.bf16.mxu0 %v1070_v17  ;;  %v3160_v17 = vld [vmem:[%s3978_s3 + $0x120] sm:$0xff]   ;;  %v3164_v19 = vld [vmem:[%s3978_s3 + $0x128] sm:$0xff]  }
 0x2ea   :  { %1348 = vmatmul.mubr.bf16.vlgmr.msra.gmra.mrb[40].mxu0 %v1069_v20  ;;  %v3165_v20 = vld [vmem:[%s3978_s3 + $0x1d8] sm:$0xff]  }
 0x2eb   :  { %2848 = vmatpush3.bf16.msra.mxu0 %v3148_v3  ;;  %v3182_v3 = vld [vmem:[%s3978_s3 + $0x218] sm:$0xff]  }
 0x2ec   :  { %2849 = vmatprep.subr.bf16.mxu0 %v3149_v4 }
 0x2ee   :  { %v1066_v21 = vld [vmem:[#allocation2 + $0x58] sm:$0xff] }
 0x2ef   :  { %v1074_v22 = vpack.c.bf16 %v1066_v21, %v1066_v21  ;;  %2850 = vmatpush3.bf16.msra.mxu0 %v3150_v7  ;;  %v3166_v21 = vld [vmem:[%s3978_s3 + $0x170] sm:$0xff]  }
 0x2f0   :  { %v1065_v23 = vld [vmem:[#allocation2 + $0x50] sm:$0xff]  ;;  %2851 = vmatprep.subr.bf16.mxu0 %v3151_v9 }
 0x2f1   :  { %1355 = vmatprep.mubr.bf16.mxu0 %v1074_v22  ;;  %v1073_v24 = vpack.c.bf16 %v1065_v23, %v1065_v23  ;;  %v3167_v22 = vld [vmem:[%s3978_s3 + $0x198] sm:$0xff]   ;;  %v3168_v23 = vld [vmem:[%s3978_s3 + $0x130] sm:$0xff]  }
 0x2f2   :  { %v3183_v9 = vld [vmem:[%s3979_s4] ss:$16 sps:$4 sm:$0xff]  }
 0x2f3   :  { %1356 = vmatmul.mubr.bf16.gmra.mrb[44].mxu0 %v1073_v24  ;;  %v3169_v24 = vld [vmem:[%s3978_s3 + $0x1e0] sm:$0xff]  }
 0x2f4   :  { %2852 = vmatpush3.bf16.msra.mxu0 %v3152_v12  ;;  %v3191_v12 = vld [vmem:[%s3979_s4 + $0x24] ss:$16 sps:$4 sm:$0xff]  }
 0x2f5   :  { %2853 = vmatprep.subr.bf16.mxu0 %v3154_v13  ;;  %v3194_v13 = vld [vmem:[%s3979_s4 + $0x2c] ss:$16 sps:$4 sm:$0xff]  }
 0x2f8   :  { %2854 = vmatpush3.bf16.msra.mxu0 %v3156_v15  ;;  %v3192_v15 = vld [vmem:[%s3979_s4 + $0x28] ss:$16 sps:$4 sm:$0xff]  }
 0x2f9   :  { %2855 = vmatprep.subr.bf16.mxu0 %v3158_v16  ;;  %v3195_v16 = vld [vmem:[%s3979_s4 + $0x40] ss:$16 sps:$4 sm:$0xff]  }
 0x2fc   :  { %2856 = vmatpush3.bf16.msra.mxu0 %v3160_v17  ;;  %v3197_v17 = vld [vmem:[%s3979_s4 + $0x44] ss:$16 sps:$4 sm:$0xff]  }
 0x2fd   :  { %2857 = vmatprep.subr.bf16.mxu0 %v3162_v18  ;;  %v3200_v18 = vld [vmem:[%s3979_s4 + $0x4c] ss:$16 sps:$4 sm:$0xff]  }
 0x300   :  { %2858 = vmatpush3.bf16.msra.mxu0 %v3164_v19  ;;  %v3198_v19 = vld [vmem:[%s3979_s4 + $0x48] ss:$16 sps:$4 sm:$0xff]  }
 0x301   :  { %2859 = vmatprep.subr.bf16.mxu0 %v3166_v21  ;;  %v3206_v21 = vld [vmem:[%s3979_s4 + $0x6c] ss:$16 sps:$4 sm:$0xff]  }
 0x304   :  { %2860 = vmatpush3.bf16.msra.mxu0 %v3168_v23  ;;  %v3204_v23 = vld [vmem:[%s3979_s4 + $0x68] ss:$16 sps:$4 sm:$0xff]  }
 0x392   :  { %v2800_v26 = vpop.f32.mrb[32].mxu0 }
 0x393   :  { %v2801_v27 = vpop.f32.mrb[33].mxu0 }
 0x394   :  { %v2802_v28 = vadd.f32 %v2801_v27, %v2800_v26  ;;  %v2803_v29 = vpop.f32.mrb[34].mxu0  ;;  %v3170_v26 = vld [vmem:[%s3978_s3 + $0x178] sm:$0xff]  }
 0x395   :  { %v2804_v30 = vpop.f32.mrb[35].mxu0  ;;  %2861 = vmatprep.subr.bf16.mxu0 %v3170_v26  ;;  %v3207_v26 = vld [vmem:[%s3980_s5 + $0x40] sm:$0xff]  }
 0x396   :  { %v2805_v31 = vadd.f32 %v2804_v30, %v2803_v29  ;;  %v1302_v41 = vadd.f32 %v2802_v28, %v28_v38  ;;  %v3171_v29 = vld [vmem:[%s3978_s3 + $0x1a0] sm:$0xff]   ;;  %v3172_v30 = vld [vmem:[%s3978_s3 + $0x138] sm:$0xff]  }
 0x397   :  { %2862 = vmatpush3.bf16.msra.mxu0 %v3172_v30 }
 0x398   :  { %v1305_v45 = vadd.f32 %v2805_v31, %v28_v38  ;;  %3028 = vmatprep.subr.bf16.mxu0 %v3246_v25 }
 0x39a   :  { %v2806_v32 = vpop.f32.mrb[36].mxu0 }
 0x39b   :  { %v2807_v33 = vpop.f32.mrb[37].mxu0 }
 0x39c   :  { %v2808_v35 = vadd.f32 %v2807_v33, %v2806_v32  ;;  %v2809_v36 = vpop.f32.mrb[38].mxu0  ;;  %v3173_v32 = vld [vmem:[%s3978_s3 + $0x1e8] sm:$0xff]  }
 0x39d   :  { %v2810_v37 = vpop.f32.mrb[39].mxu0 }
 0x39e   :  { %v1310_v54 = vadd.f32 %v2808_v35, %v28_v38 }
 0x3bd   :  { %v2828_v39 = vpop.f32.mrb[40].mxu0 }
 0x3be   :  { %v2829_v40 = vpop.f32.mrb[41].mxu0 }
 0x3bf   :  { %v2830_v42 = vadd.f32 %v2829_v40, %v2828_v39  ;;  %v2831_v43 = vpop.f32.mrb[42].mxu0  ;;  %v3174_v39 = vld [vmem:[%s3978_s3 + $0x1a8] sm:$0xff]   ;;  %v3176_v40 = vld [vmem:[%s3978_s3 + $0x1f0] sm:$0xff]  }
 0x3c0   :  { %v2832_v44 = vpop.f32.mrb[43].mxu0 }
 0x3c1   :  { %v1350_v46 = vadd.f32 %v2830_v42, %v1302_v41  ;;  %v2833_v47 = vadd.f32 %v2832_v44, %v2831_v43  ;;  %v3177_v41 = vld [vmem:[%s3978_s3 + $0x1b0] sm:$0xff]   ;;  %v3179_v42 = vld [vmem:[%s3978_s3 + $0x1f8] sm:$0xff]  }
 0x3c3   :  { %v1353_v48 = vadd.f32 %v2833_v47, %v1305_v45  ;;  %v1363_v49 = vmax.f32 %v1350_v46, 0.0  ;;  %v3180_v46 = vld [vmem:[%s3978_s3 + $0x1b8] sm:$0xff]  }
 0x3c5   :  { %v1364_v50 = vmax.f32 %v1353_v48, 0.0 }
 0x3c6   :  { %v2834_v51 = vpop.f32.mrb[44].mxu0 }
 0x3c7   :  { %v1375_v52 = vpack.c.bf16 %v1364_v50, %v1363_v49  ;;  %v2835_v53 = vpop.f32.mrb[45].mxu0 }
 0x3c8   :  { %v2836_v55 = vadd.f32 %v2835_v53, %v2834_v51  ;;  %v2837_v56 = vpop.f32.mrb[46].mxu0 }
 0x3c9   :  { %v2838_v57 = vpop.f32.mrb[47].mxu0  ;;  %3005 = vmatpush3.bf16.msra.mxu1 %v1375_v52  ;;  %v3185_v52 = vld [vmem:[%s3979_s4 + $0x4] ss:$16 sps:$4 sm:$0xff]  }
 0x3ca   :  { %v1358_v58 = vadd.f32 %v2836_v55, %v1310_v54  ;;  %3006 = vmatprep.subr.bf16.mxu1 %v3246_v25 }
 0x3cc   :  { %v1365_v59 = vmax.f32 %v1358_v58, 0.0 }
 0x3ce   :  { %v1376_v60 = vpack.c.bf16 %v1365_v59, %v1365_v59 }
 0x3d0   :  { %v1418_v61 = vsel %vm1416_vm5, %v1376_v60, 0 }
 0x3d1   :  { %3007 = vmatpush3.bf16.msra.mxu1 %v1418_v61 }
 0x3d2   :  { %2869 = vmatprep.subr.bf16.mxu1 %v3153_v5 }
 0x3d4   :  { %3009 = vmatmul.mubr.msk.bf16.vlgmr.msra.gmra.mrb[48].mxu1 %vm1400_vm6, %v3142_v34 }
 0x3d5   :  { %3012 = vmatprep.mubr.msk.bf16.mxu1 %vm3247_vm4, %v3246_v25  ;;  %2870 = vmatpush3.bf16.msra.mxu1 %v3155_v6 }
 0x3d6   :  { %2871 = vmatprep.subr.bf16.mxu1 %v3157_v8 }
 0x3d9   :  { %2872 = vmatpush3.bf16.msra.mxu1 %v3159_v10 }
 0x3da   :  { %2873 = vmatprep.subr.bf16.mxu1 %v3161_v11  ;;  %v3186_v11 = vld [vmem:[%s3979_s4 + $0x8] ss:$16 sps:$4 sm:$0xff]  }
 0x3dc   :  { %3013 = vmatmul.mubr.msk.bf16.gmra.mrb[52].mxu1 %vm1400_vm6, %v3143_v62  ;;  %v3175_v62 = vld [vmem:[%s3978_s3 + $0x200] sm:$0xff]  }
 0x3dd   :  { %3016 = vmatprep.mubr.msk.bf16.mxu1 %vm3247_vm4, %v3246_v25  ;;  %2874 = vmatpush3.bf16.msra.mxu1 %v3163_v14  ;;  %v3189_v14 = vld [vmem:[%s3979_s4 + $0x20] ss:$16 sps:$4 sm:$0xff]  }
 0x3de   :  { %2875 = vmatprep.subr.bf16.mxu1 %v3165_v20  ;;  %v3203_v20 = vld [vmem:[%s3979_s4 + $0x64] ss:$16 sps:$4 sm:$0xff]  }
 0x3e1   :  { %2876 = vmatpush3.bf16.msra.mxu1 %v3167_v22  ;;  %v3201_v22 = vld [vmem:[%s3979_s4 + $0x60] ss:$16 sps:$4 sm:$0xff]  }
 0x3e2   :  { %2877 = vmatprep.subr.bf16.mxu1 %v3169_v24  ;;  %v3248_v24 = vmov 0  }
 0x3e4   :  { %3017 = vmatmul.mubr.msk.bf16.gmra.mrb[56].mxu1 %vm1400_vm6, %v3144_v63 }
 0x3e5   :  { %3020 = vmatprep.mubr.msk.bf16.mxu1 %vm3247_vm4, %v3246_v25  ;;  %2878 = vmatpush3.bf16.msra.mxu1 %v3171_v29 }
 0x3e6   :  { %2879 = vmatprep.subr.bf16.mxu1 %v3173_v32 }
 0x3e9   :  { %2880 = vmatpush3.bf16.msra.mxu1 %v3174_v39 }
 0x3ea   :  { %2881 = vmatprep.subr.bf16.mxu1 %v3176_v40 }
 0x3ec   :  { %3021 = vmatmul.mubr.msk.bf16.gmra.mrb[60].mxu1 %vm1400_vm6, %v3145_v0  ;;  %v3178_v0 = vld [vmem:[%s3978_s3 + $0x208] sm:$0xff]  }
 0x3ed   :  { %3024 = vmatprep.mubr.msk.bf16.mxu1 %vm3247_vm4, %v3246_v25  ;;  %2882 = vmatpush3.bf16.msra.mxu1 %v3177_v41 }
 0x3ee   :  { %2883 = vmatprep.subr.bf16.mxu1 %v3179_v42 }
 0x3f1   :  { %2884 = vmatpush3.bf16.msra.mxu1 %v3180_v46 }
 0x3f2   :  { %2062 = vmatprep.subr.bf16.mxu1 %v3185_v52  ;;  %v3213_v52 = vld [vmem:[%s3980_s5 + $0xc8] sm:$0xff]  }
 0x3f4   :  { %3025 = vmatmul.mubr.msk.bf16.gmra.mrb[64].mxu1 %vm1400_vm6, %v3146_v1 }
 0x4a7   :  { %v1454_v27 = vpop.f32.mrb[48].mxu1 }
 0x4a8   :  { %1493 = vst.msk [vmem:[#allocation3] sm:$0xff] %vm1492_vm7, %v1454_v27  ;;  %v3010_v28 = vpop.f32.mrb[49].mxu1  ;;  %v3209_v27 = vld [vmem:[%s3980_s5 + $0xc0] sm:$0xff]  }
 0x4a9   :  { %v1457_v31 = vpop.f32.mrb[50].mxu1 }
 0x4aa   :  { %v3011_v33 = vpop.f32.mrb[51].mxu1  ;;  %1495 = vrot.lane.b32.xlu1 %v1457_v31, %s3244_s19 }
 0x4ab   :  { %v29_v33 = vld [vmem:[%s3977_s6 + $0x2] ss:$0 sm:$0xff] }
 0x4af   :  { %v1462_v35 = vpop.f32.mrb[52].mxu1 }
 0x4b0   :  { %1500 = vst.msk [vmem:[#allocation3 + $0x8] sm:$0xff] %vm1492_vm7, %v1462_v35  ;;  %v3014_v36 = vpop.f32.mrb[53].mxu1 }
 0x4b1   :  { %v1465_v37 = vpop.f32.mrb[54].mxu1 }
 0x4b2   :  { %1502 = vrot.lane.b32.xlu0 %v1465_v37, %s3244_s19  ;;  %v3015_v38 = vpop.f32.mrb[55].mxu1 }
 0x4b7   :  { %v1470_v43 = vpop.f32.mrb[56].mxu1 }
 0x4b8   :  { %1506 = vst.msk [vmem:[#allocation3 + $0x10] sm:$0xff] %vm1492_vm7, %v1470_v43  ;;  %v3018_v44 = vpop.f32.mrb[57].mxu1 }
 0x4b9   :  { %v1473_v45 = vpop.f32.mrb[58].mxu1 }
 0x4ba   :  { %v3019_v47 = vpop.f32.mrb[59].mxu1  ;;  %1508 = vrot.lane.b32.xlu1 %v1473_v45, %s3244_s19 }
 0x4bf   :  { %v1478_v48 = vpop.f32.mrb[60].mxu1 }
 0x4c0   :  { %1512 = vst.msk [vmem:[#allocation3 + $0x18] sm:$0xff] %vm1492_vm7, %v1478_v48  ;;  %v3022_v49 = vpop.f32.mrb[61].mxu1  ;;  %v3208_v48 = vld [vmem:[%s3980_s5] sm:$0xff]  }
 0x4c1   :  { %v1481_v50 = vpop.f32.mrb[62].mxu1  ;;  %v3210_v49 = vld [vmem:[%s3980_s5 + $0x80] sm:$0xff]  }
 0x4c2   :  { %1514 = vrot.lane.b32.xlu0 %v1481_v50, %s3244_s19  ;;  %v3023_v51 = vpop.f32.mrb[63].mxu1 }
 0x4c3   :  { %v3211_v51 = vld [vmem:[%s3980_s5 + $0x48] sm:$0xff]  }
 0x4c7   :  { %v1486_v53 = vpop.f32.mrb[64].mxu1 }
 0x4c8   :  { %1518 = vst.msk [vmem:[#allocation3 + $0x20] sm:$0xff] %vm1492_vm7, %v1486_v53  ;;  %v3026_v54 = vpop.f32.mrb[65].mxu1  ;;  %v3212_v53 = vld [vmem:[%s3980_s5 + $0x8] sm:$0xff]  }
 0x4c9   :  { %v1489_v55 = vpop.f32.mrb[66].mxu1  ;;  %v3214_v54 = vld [vmem:[%s3980_s5 + $0x88] sm:$0xff]  }
 0x4ca   :  { %v3027_v56 = vpop.f32.mrb[67].mxu1  ;;  %v3215_v55 = vld [vmem:[%s3980_s5 + $0x50] sm:$0xff]  }
 0x4cb   :  { %v3217_v56 = vld [vmem:[%s3980_s5 + $0xd0] sm:$0xff]  }
 0x4cf   :  { %v1595_v4 = vld [vmem:[#allocation3 + $0x20] sm:$0xff] }
 0x4d0   :  { %v1600_v7 = vpack.c.bf16 %v1595_v4, %v1595_v4  ;;  %v3228_v4 = vld [vmem:[%s3980_s5 + $0x28] sm:$0xff]  }
 0x51c   :  { %v1496_v57 = vpop.permute.xlu1 %1495 }
 0x51d   :  { %1499 = vst.msk [vmem:[#allocation3] sm:$0xff] %vm1498_vm8, %v1496_v57  ;;  %v3216_v57 = vld [vmem:[%s3980_s5 + $0x10] sm:$0xff]  }
 0x524   :  { %v1503_v58 = vpop.permute.xlu0 %1502  ;;  %v1591_v59 = vld [vmem:[#allocation3] sm:$0xff] }
 0x525   :  { %1505 = vst.msk [vmem:[#allocation3 + $0x8] sm:$0xff] %vm1498_vm8, %v1503_v58  ;;  %v1596_v63 = vpack.c.bf16 %v1591_v59, %v1591_v59  ;;  %v3218_v58 = vld [vmem:[%s3980_s5 + $0x90] sm:$0xff]   ;;  %v3219_v59 = vld [vmem:[%s3980_s5 + $0x58] sm:$0xff]  }
 0x52c   :  { %v1592_v60 = vld [vmem:[#allocation3 + $0x8] sm:$0xff]  ;;  %v1509_v61 = vpop.permute.xlu1 %1508 }
 0x52d   :  { %v1597_v34 = vpack.c.bf16 %v1592_v60, %v1592_v60  ;;  %1511 = vst.msk [vmem:[#allocation3 + $0x10] sm:$0xff] %vm1498_vm8, %v1509_v61  ;;  %v3221_v60 = vld [vmem:[%s3980_s5 + $0xd8] sm:$0xff]  }
 0x52e   :  { %v3220_v61 = vld [vmem:[%s3980_s5 + $0x18] sm:$0xff]  }
 0x52f   :  { %1852 = vmatprep.mubr.bf16.mxu0 %v1597_v34  ;;  %v3222_v34 = vld [vmem:[%s3980_s5 + $0x98] sm:$0xff]  }
 0x530   :  { %1853 = vmatmul.mubr.bf16.vlgmr.msra.gmra.mrb[48].mxu0 %v1596_v63  ;;  %v3225_v63 = vld [vmem:[%s3980_s5 + $0xe0] sm:$0xff]  }
 0x531   :  { %3029 = vmatpush3.bf16.msra.mxu0 %v3175_v62  ;;  %3036 = vmatprep.mubr.msk.bf16.mxu0 %vm3247_vm4, %v3246_v25  ;;  %v3223_v62 = vld [vmem:[%s3980_s5 + $0x60] sm:$0xff]  }
 0x532   :  { %3030 = vmatprep.subr.bf16.mxu0 %v3246_v25 }
 0x534   :  { %v1515_v1 = vpop.permute.xlu0 %1514  ;;  %v1593_v5 = vld [vmem:[#allocation3 + $0x10] sm:$0xff] }
 0x535   :  { %1517 = vst.msk [vmem:[#allocation3 + $0x18] sm:$0xff] %vm1498_vm8, %v1515_v1  ;;  %3031 = vmatpush3.bf16.msra.mxu0 %v3178_v0  ;;  %v1598_v10 = vpack.c.bf16 %v1593_v5, %v1593_v5  ;;  %v3224_v0 = vld [vmem:[%s3980_s5 + $0x20] sm:$0xff]   ;;  %v3230_v5 = vld [vmem:[%s3980_s5 + $0xa8] sm:$0xff]  }
 0x536   :  { %3032 = vmatprep.subr.bf16.mxu0 %v3246_v25  ;;  %v3226_v1 = vld [vmem:[%s3980_s5 + $0xa0] sm:$0xff]  }
 0x539   :  { %3033 = vmatpush3.bf16.msra.mxu0 %v3181_v2  ;;  %v3227_v2 = vld [vmem:[%s3980_s5 + $0x68] sm:$0xff]  }
 0x53a   :  { %3034 = vmatprep.subr.bf16.mxu0 %v3246_v25  ;;  %v3188_v25 = vld [vmem:[%s3979_s4 + $0xc] ss:$16 sps:$4 sm:$0xff]  }
 0x53c   :  { %v1594_v6 = vld [vmem:[#allocation3 + $0x18] sm:$0xff] }
 0x53d   :  { %v1599_v8 = vpack.c.bf16 %v1594_v6, %v1594_v6  ;;  %3035 = vmatpush3.bf16.msra.mxu0 %v3182_v3  ;;  %v3229_v3 = vld [vmem:[%s3980_s5 + $0xe8] sm:$0xff]   ;;  %v3231_v6 = vld [vmem:[%s3980_s5 + $0x70] sm:$0xff]  }
 0x53e   :  { %2103 = vmatprep.subr.bf16.mxu0 %v3188_v25  ;;  %v3236_v25 = vld [vmem:[%s3980_s5 + $0x38] sm:$0xff]  }
 0x53f   :  { %1892 = vmatprep.mubr.bf16.mxu1 %v1599_v8  ;;  %v3232_v8 = vld [vmem:[%s3980_s5 + $0x30] sm:$0xff]  }
 0x540   :  { %1893 = vmatmul.mubr.bf16.vlgmr.msra.gmra.mrb[68].mxu1 %v1598_v10  ;;  %3037 = vmatmul.mubr.msk.bf16.vlgmr.msra.gmra.mrb[52].mxu0 %vm1492_vm7, %v1600_v7  ;;  %v3233_v7 = vld [vmem:[%s3980_s5 + $0xf0] sm:$0xff]   ;;  %v3235_v10 = vld [vmem:[%s3980_s5 + $0x78] sm:$0xff]  }
 0x541   :  { %2063 = vmatpush1.bf16.msra.mxu1 %v3183_v9  ;;  %2104 = vmatpush1.bf16.msra.mxu0 %v3186_v11  ;;  %v3234_v9 = vld [vmem:[%s3980_s5 + $0xb0] sm:$0xff]   ;;  %v3237_v11 = vld [vmem:[%s3980_s5 + $0xf8] sm:$0xff]  }
 0x542   :  { %2064 = vmatprep.subr.bf16.mxu1 %v3191_v12  ;;  %2105 = vmatprep.subr.bf16.mxu0 %v3194_v13  ;;  %v3238_v12 = vld [vmem:[%s3980_s5 + $0xb8] sm:$0xff]   ;;  %v1959_v13 = vlaneseq }
 0x543   :  { %2094 = vmatprep.mubr.bf16.mxu1 %v3248_v24  ;;  %2135 = vmatprep.mubr.bf16.mxu0 %v3248_v24 }
 0x545   :  { %2065 = vmatpush1.bf16.msra.mxu1 %v3189_v14  ;;  %2106 = vmatpush1.bf16.msra.mxu0 %v3192_v15  ;;  %v1960_v14 = vshrl.u32 %v1959_v13, 7 }
 0x546   :  { %2066 = vmatprep.subr.bf16.mxu1 %v3197_v17  ;;  %2107 = vmatprep.subr.bf16.mxu0 %v3200_v18  ;;  %v2502_v17 = vld [vmem:[%s3977_s6 + $0x3] ss:$8 sm:$0xf] }
 0x547   :  { %v1961_v15 = vsub.s32 0, %v1960_v14  ;;  %v1965_v18 = vsub.s32 1, %v1960_v14 }
 0x549   :  { %2067 = vmatpush1.bf16.msra.mxu1 %v3195_v16  ;;  %2108 = vmatpush1.bf16.msra.mxu0 %v3198_v19  ;;  %v1969_v16 = vsub.s32 2, %v1960_v14  ;;  %v1973_v19 = vsub.s32 3, %v1960_v14 }
 0x54a   :  { %2068 = vmatprep.subr.bf16.mxu1 %v3203_v20  ;;  %2109 = vmatprep.subr.bf16.mxu0 %v3206_v21  ;;  %v1962_v20 = vrot.slane %v2502_v17, %v1961_v15 }
 0x54b   :  { %v1970_v21 = vrot.slane %v2502_v17, %v1969_v16 }
 0x54d   :  { %2069 = vmatpush1.bf16.msra.mxu1 %v3201_v22  ;;  %2110 = vmatpush1.bf16.msra.mxu0 %v3204_v23  ;;  %v1966_v22 = vrot.slane %v2502_v17, %v1965_v18  ;;  %v1974_v23 = vrot.slane %v2502_v17, %v1973_v19 }
 0x54e   :  { %2896 = vmatprep.subr.bf16.mxu1 %v3207_v26  ;;  %2918 = vmatprep.subr.bf16.mxu0 %v3209_v27 }
 0x603   :  { %v2863_v28 = vpop.f32.mrb[48].mxu0 }
 0x604   :  { %v2864_v29 = vpop.f32.mrb[49].mxu0 }
 0x605   :  { %v2865_v30 = vadd.f32 %v2864_v29, %v2863_v28  ;;  %v2866_v31 = vpop.f32.mrb[50].mxu0 }
 0x606   :  { %v2867_v32 = vpop.f32.mrb[51].mxu0 }
 0x607   :  { %v1855_v39 = vadd.f32 %v2865_v30, %v29_v33 }
 0x613   :  { %v2885_v35 = vpop.f32.mrb[68].mxu1  ;;  %v1934_v36 = vpop.f32.mrb[52].mxu0 }
 0x614   :  { %v2886_v37 = vpop.f32.mrb[69].mxu1  ;;  %v3038_v38 = vpop.f32.mrb[53].mxu0 }
 0x615   :  { %v2887_v40 = vadd.f32 %v2886_v37, %v2885_v35  ;;  %v2888_v41 = vpop.f32.mrb[70].mxu1  ;;  %v1937_v42 = vpop.f32.mrb[54].mxu0 }
 0x616   :  { %v2889_v43 = vpop.f32.mrb[71].mxu1  ;;  %v3039_v44 = vpop.f32.mrb[55].mxu0 }
 0x617   :  { %v1895_v45 = vadd.f32 %v2887_v40, %v1855_v39 }
 0x619   :  { %v1935_v46 = vadd.f32 %v1934_v36, %v1895_v45 }
 0x61b   :  { %v1940_v47 = vmax.f32 %v1935_v46, 0.0 }
 0x61d   :  { %v1941_v50 = vpack.c.bf16 %v1940_v47, %v1940_v47 }
 0x61f   :  { %2654 = vmatmul.mubr.msk.bf16.vlgmr.msra.gmra.mrb[72].mxu1 %vm1492_vm7, %v1941_v50  ;;  %2655 = vmatmul.mubr.msk.bf16.vlgmr.msra.gmra.mrb[56].mxu0 %vm1492_vm7, %v1941_v50 }
 0x620   :  { %2897 = vmatpush3.bf16.msra.mxu1 %v3208_v48  ;;  %2919 = vmatpush3.bf16.msra.mxu0 %v3210_v49  ;;  %v32_v48 = vld [vmem:[%s3977_s6 + $0x4] ss:$0 sm:$0xff] }
 0x621   :  { %2898 = vmatprep.subr.bf16.mxu1 %v3211_v51  ;;  %2920 = vmatprep.subr.bf16.mxu0 %v3213_v52 }
 0x624   :  { %2899 = vmatpush3.bf16.msra.mxu1 %v3212_v53  ;;  %2921 = vmatpush3.bf16.msra.mxu0 %v3214_v54 }
 0x625   :  { %2900 = vmatprep.subr.bf16.mxu1 %v3215_v55  ;;  %2922 = vmatprep.subr.bf16.mxu0 %v3217_v56 }
 0x628   :  { %2901 = vmatpush3.bf16.msra.mxu1 %v3216_v57  ;;  %2923 = vmatpush3.bf16.msra.mxu0 %v3218_v58 }
 0x629   :  { %2902 = vmatprep.subr.bf16.mxu1 %v3219_v59  ;;  %2924 = vmatprep.subr.bf16.mxu0 %v3221_v60 }
 0x62c   :  { %2903 = vmatpush3.bf16.msra.mxu1 %v3220_v61  ;;  %2925 = vmatpush3.bf16.msra.mxu0 %v3222_v34 }
 0x62d   :  { %2904 = vmatprep.subr.bf16.mxu1 %v3223_v62  ;;  %2926 = vmatprep.subr.bf16.mxu0 %v3225_v63 }
 0x630   :  { %2905 = vmatpush3.bf16.msra.mxu1 %v3224_v0  ;;  %2927 = vmatpush3.bf16.msra.mxu0 %v3226_v1 }
 0x631   :  { %2906 = vmatprep.subr.bf16.mxu1 %v3227_v2  ;;  %2928 = vmatprep.subr.bf16.mxu0 %v3229_v3 }
 0x634   :  { %2907 = vmatpush3.bf16.msra.mxu1 %v3228_v4  ;;  %2929 = vmatpush3.bf16.msra.mxu0 %v3230_v5 }
 0x635   :  { %2908 = vmatprep.subr.bf16.mxu1 %v3231_v6  ;;  %2930 = vmatprep.subr.bf16.mxu0 %v3233_v7 }
 0x638   :  { %2909 = vmatpush3.bf16.msra.mxu1 %v3232_v8  ;;  %2931 = vmatpush3.bf16.msra.mxu0 %v3234_v9 }
 0x639   :  { %2910 = vmatprep.subr.bf16.mxu1 %v3235_v10  ;;  %2932 = vmatprep.subr.bf16.mxu0 %v3237_v11 }
 0x63c   :  { %2911 = vmatpush3.bf16.msra.mxu1 %v3236_v25  ;;  %2933 = vmatpush3.bf16.msra.mxu0 %v3238_v12 }
 0x6f2   :  { %v2096_v24 = vpop.f32.mrb[72].mxu1  ;;  %v2137_v26 = vpop.f32.mrb[56].mxu0 }
 0x6f3   :  { %v2097_v27 = vadd.f32 %v2096_v24, %v1962_v20  ;;  %v2098_v28 = vpop.f32.mrb[73].mxu1  ;;  %v2138_v29 = vadd.f32 %v2137_v26, %v1970_v21  ;;  %v2139_v30 = vpop.f32.mrb[57].mxu0 }
 0x6f4   :  { %v2099_v31 = vadd.f32 %v2098_v28, %v1966_v22  ;;  %v2140_v32 = vadd.f32 %v2139_v30, %v1974_v23  ;;  %v2100_v33 = vpop.f32.mrb[74].mxu1  ;;  %v2141_v35 = vpop.f32.mrb[58].mxu0 }
 0x6f5   :  { %v2144_v36 = vmax.f32 %v2097_v27, 0.0  ;;  %v2146_v37 = vmax.f32 %v2138_v29, 0.0  ;;  %v2101_v38 = vpop.f32.mrb[75].mxu1  ;;  %v2142_v39 = vpop.f32.mrb[59].mxu0 }
 0x6f6   :  { %v2145_v40 = vmax.f32 %v2099_v31, 0.0  ;;  %v2147_v41 = vmax.f32 %v2140_v32, 0.0 }
 0x6f7   :  { %v2148_v44 = vpack.c.bf16 %v2144_v36, %v2144_v36  ;;  %v2150_v45 = vpack.c.bf16 %v2146_v37, %v2146_v37 }
 0x6f8   :  { %v2149_v42 = vpack.c.bf16 %v2145_v40, %v2145_v40  ;;  %v2151_v43 = vpack.c.bf16 %v2147_v41, %v2147_v41 }
 0x6fa   :  { %2440 = vmatprep.mubr.bf16.mxu1 %v2149_v42  ;;  %2480 = vmatprep.mubr.bf16.mxu0 %v2151_v43 }
 0x6fb   :  { %2441 = vmatmul.mubr.bf16.vlgmr.msra.gmra.mrb[76].mxu1 %v2148_v44  ;;  %2481 = vmatmul.mubr.bf16.vlgmr.msra.gmra.mrb[60].mxu0 %v2150_v45 }
 0x7ce   :  { %v2912_v46 = vpop.f32.mrb[76].mxu1  ;;  %v2934_v47 = vpop.f32.mrb[60].mxu0 }
 0x7cf   :  { %v2913_v49 = vpop.f32.mrb[77].mxu1  ;;  %v2935_v50 = vpop.f32.mrb[61].mxu0 }
 0x7d0   :  { %v2914_v51 = vadd.f32 %v2913_v49, %v2912_v46  ;;  %v2936_v52 = vadd.f32 %v2935_v50, %v2934_v47  ;;  %v2915_v53 = vpop.f32.mrb[78].mxu1  ;;  %v2937_v54 = vpop.f32.mrb[62].mxu0 }
 0x7d1   :  { %v2916_v55 = vpop.f32.mrb[79].mxu1  ;;  %v2938_v56 = vpop.f32.mrb[63].mxu0 }
 0x7d2   :  { %v2443_v57 = vadd.f32 %v2914_v51, %v32_v48 }
 0x7d4   :  { %v2483_v58 = vadd.f32 %v2936_v52, %v2443_v57 }
 0x7d6   :  { %2488 = vmax.xlane.f32.xlu0 %v2483_v58 }
 0x863   :  { %v2489_v59 = vpop.xlane.xlu0 %2488 }
 0x864   :  { %v2490_v60 = vsub.f32 %v2483_v58, %v2489_v59 }
 0x866   :  { %v2491_v61 = vmul.f32 1.442695, %v2490_v60 }
 0x868   :  { %3239 = vpow2.f32 %v2491_v61 }
 0x872   :  { %v3240_v34 = vpop.eup %3239 }
 0x873   :  { %2493 = vadd.xlane.f32.xlu1 %v3240_v34 }
 0x900   :  { %v2494_v62 = vpop.xlane.xlu1 %2493 }
 0x901   :  { %3241 = vrcp.f32 %v2494_v62 }
 0x90b   :  { %v3242_v63 = vpop.eup %3241 }
 0x90c   :  { %v2496_v0 = vmul.f32 %v3242_v63, %v3240_v34 }
 0x90e   :  { %2497 = vst [vmem:[%s3981_s7] sm:$0xff] %v2496_v0 }

</bundles_post_ra>
